<compile_context>
chip_gen: v5e
topology: v5e:2x2
jax: 0.10.0
libtpu: 0.0.40
codegen_flags: <defaults>
</compile_context>

<pallas_src>
import math
import functools

import jax
import jax.numpy as jnp
import numpy as np
from jax.experimental import pallas as pl
from jax.experimental.pallas import tpu as pltpu

D_MODEL = 32
NUM_HEADS = 4
D_FF = 64
D_K = D_MODEL // NUM_HEADS
EPS = 1e-5
NEG_INF = -1e30


def encoder_layer_kernel(x_ref, bias_ref,
                         wq_ref, bq_ref, wk_ref, bk_ref, wv_ref, bv_ref,
                         wo_ref, bo_ref,
                         w1_ref, b1_ref, w2_ref, b2_ref,
                         g1_ref, be1_ref, g2_ref, be2_ref,
                         out_ref, *, num_heads, d_k):
    f32 = jnp.float32
    x = x_ref[...]          # (R, D)  R = block_batches * T (flattened rows)
    bias = bias_ref[...]    # (R, R)  0 within a batch element, -1e30 across

    # ---- Q/K/V projections: one big row-matmul each ----
    q = jnp.dot(x, wq_ref[...], preferred_element_type=f32) + bq_ref[...]
    k = jnp.dot(x, wk_ref[...], preferred_element_type=f32) + bk_ref[...]
    v = jnp.dot(x, wv_ref[...], preferred_element_type=f32) + bv_ref[...]

    scale = 1.0 / math.sqrt(d_k)
    attn = jnp.zeros(x.shape, f32)
    for h in range(num_heads):                         # static unroll over heads
        sl = slice(h * d_k, (h + 1) * d_k)
        qh = q[:, sl]
        kh = k[:, sl]
        vh = v[:, sl]
        s = jnp.dot(qh, kh.T, preferred_element_type=f32) * scale + bias
        s = s - jnp.max(s, axis=-1, keepdims=True)
        p = jnp.exp(s)
        p = p * pl.reciprocal(jnp.sum(p, axis=-1, keepdims=True), approx=True)
        pv = jnp.dot(p, vh, preferred_element_type=f32)            # (R, d_k)
        # Accumulate this head's slice of the output projection directly
        # (wo_ref is pre-split per head: (H, d_k, D)) -> no lane-axis concat.
        attn = attn + jnp.dot(pv, wo_ref[h], preferred_element_type=f32)
    attn = attn + bo_ref[...]

    # ---- residual + LayerNorm 1 ----
    y = x + attn
    mu = jnp.mean(y, axis=-1, keepdims=True)
    var = jnp.mean((y - mu) ** 2, axis=-1, keepdims=True)
    y = (y - mu) * jax.lax.rsqrt(var + EPS) * g1_ref[...] + be1_ref[...]

    # ---- position-wise feed-forward ----
    h1 = jnp.dot(y, w1_ref[...], preferred_element_type=f32) + b1_ref[...]
    h1 = jnp.maximum(h1, 0.0)
    ff = jnp.dot(h1, w2_ref[...], preferred_element_type=f32) + b2_ref[...]

    # ---- residual + LayerNorm 2 ----
    z = y + ff
    mu2 = jnp.mean(z, axis=-1, keepdims=True)
    var2 = jnp.mean((z - mu2) ** 2, axis=-1, keepdims=True)
    out_ref[...] = (z - mu2) * jax.lax.rsqrt(var2 + EPS) * g2_ref[...] + be2_ref[...]


def _const_spec(shape):
    nd = len(shape)
    return pl.BlockSpec(shape, lambda i, _nd=nd: (0,) * _nd)


def _pick_block_batches(batch, seq, target_rows=512):
    """Largest divisor of `batch` whose row count stays near target_rows."""
    bb = max(1, min(batch, max(1, target_rows // max(seq, 1))))
    while batch % bb != 0:
        bb -= 1
    return bb


@jax.jit
def encoder_layer(x, params):
    (wq, bq, wk, bk, wv, bv, wo, bo, w1, b1, w2, b2, g1, be1, g2, be2) = params
    B, T, D = x.shape
    bb = _pick_block_batches(B, T)      # whole batch elements per row-block
    R = bb * T                          # rows per grid step
    num_blocks = B // bb

    x2 = x.reshape(B * T, D)            # flatten (B, T) into the row axis
    # Pre-split output projection per head: wo[h*d_k + i, j] -> wo3[h, i, j].
    wo3 = wo.reshape(NUM_HEADS, D_K, D)

    # Static block-diagonal additive attention bias over the flattened rows:
    # rows belonging to different batch elements must not attend to each other.
    ids = np.repeat(np.arange(bb), T)
    bias_np = np.where(ids[:, None] == ids[None, :], 0.0, NEG_INF).astype(np.float32)
    bias = jnp.asarray(bias_np)

    consts = (wq, bq, wk, bk, wv, bv, wo3, bo, w1, b1, w2, b2, g1, be1, g2, be2)

    in_specs = [pl.BlockSpec((R, D), lambda i: (i, 0)),
                _const_spec((R, R))]
    in_specs += [_const_spec(p.shape) for p in consts]
    out_specs = pl.BlockSpec((R, D), lambda i: (i, 0))

    kernel = functools.partial(encoder_layer_kernel,
                               num_heads=NUM_HEADS, d_k=D_K)

    out2 = pl.pallas_call(
        kernel,
        out_shape=jax.ShapeDtypeStruct((B * T, D), jnp.float32),
        grid_spec=pltpu.PrefetchScalarGridSpec(
            num_scalar_prefetch=0,
            grid=(num_blocks,),
            in_specs=in_specs,
            out_specs=out_specs,
        ),
        compiler_params=pltpu.CompilerParams(
            dimension_semantics=("parallel",)),
    )(x2, bias, *consts)
    return out2.reshape(B, T, D)


def make_params(key):
    """Deterministic synthetic parameters (shapes per module __init__)."""
    ks = jax.random.split(key, 8)
    s = 0.1
    wq = s * jax.random.normal(ks[0], (D_MODEL, D_MODEL), jnp.float32)
    wk = s * jax.random.normal(ks[1], (D_MODEL, D_MODEL), jnp.float32)
    wv = s * jax.random.normal(ks[2], (D_MODEL, D_MODEL), jnp.float32)
    wo = s * jax.random.normal(ks[3], (D_MODEL, D_MODEL), jnp.float32)
    w1 = s * jax.random.normal(ks[4], (D_MODEL, D_FF), jnp.float32)
    w2 = s * jax.random.normal(ks[5], (D_FF, D_MODEL), jnp.float32)
    bq = 0.01 * jax.random.normal(ks[6], (1, D_MODEL), jnp.float32)
    bk = jnp.zeros((1, D_MODEL), jnp.float32)
    bv = jnp.zeros((1, D_MODEL), jnp.float32)
    bo = 0.01 * jax.random.normal(ks[7], (1, D_MODEL), jnp.float32)
    b1 = jnp.zeros((1, D_FF), jnp.float32)
    b2 = jnp.zeros((1, D_MODEL), jnp.float32)
    g1 = jnp.ones((1, D_MODEL), jnp.float32)    # LayerNorm weight (default init)
    be1 = jnp.zeros((1, D_MODEL), jnp.float32)  # LayerNorm bias
    g2 = jnp.ones((1, D_MODEL), jnp.float32)
    be2 = jnp.zeros((1, D_MODEL), jnp.float32)
    return (wq, bq, wk, bk, wv, bv, wo, bo, w1, b1, w2, b2, g1, be1, g2, be2)


def reference_encoder_layer(x, params):
    (wq, bq, wk, bk, wv, bv, wo, bo, w1, b1, w2, b2, g1, be1, g2, be2) = params
    B, T, D = x.shape

    def proj(t, w, b):
        return t @ w + b

    q = proj(x, wq, bq).reshape(B, T, NUM_HEADS, D_K).transpose(0, 2, 1, 3)
    k = proj(x, wk, bk).reshape(B, T, NUM_HEADS, D_K).transpose(0, 2, 1, 3)
    v = proj(x, wv, bv).reshape(B, T, NUM_HEADS, D_K).transpose(0, 2, 1, 3)
    scores = jnp.einsum("bhqd,bhkd->bhqk", q, k) / math.sqrt(D_K)
    attn_w = jax.nn.softmax(scores, axis=-1)
    attn = jnp.einsum("bhqk,bhkd->bhqd", attn_w, v)
    attn = attn.transpose(0, 2, 1, 3).reshape(B, T, D)
    attn = proj(attn, wo, bo)

    def ln(y, g, b):
        mu = jnp.mean(y, axis=-1, keepdims=True)
        var = jnp.mean((y - mu) ** 2, axis=-1, keepdims=True)
        return (y - mu) * jax.lax.rsqrt(var + EPS) * g + b

    y = ln(x + attn, g1, be1)
    ff = proj(jax.nn.relu(proj(y, w1, b1)), w2, b2)
    return ln(y + ff, g2, be2)


if __name__ == "__main__":
    B, T = 2, 8
    key = jax.random.PRNGKey(0)
    kx, kp = jax.random.split(key)
    x = jax.random.normal(kx, (B, T, D_MODEL), jnp.float32)
    params = make_params(kp)

    out = encoder_layer(x, params)
    out = jax.block_until_ready(out)

    ref = reference_encoder_layer(x, params)
    # Tolerance accounts for the approximate (EUP) reciprocal in the softmax.
    np.testing.assert_allclose(np.asarray(out), np.asarray(ref), rtol=1e-2, atol=1e-2)

    print("KERNEL_OK")
</pallas_src>

<mosaic_0001>
module attributes {stable_mosaic.version = 11 : i64} {
  func.func @encoder_layer_kernel(%arg0: i32, %arg1: memref<16x32xf32, #tpu.memory_space<vmem>>, %arg2: memref<16x16xf32, #tpu.memory_space<vmem>>, %arg3: memref<32x32xf32, #tpu.memory_space<vmem>>, %arg4: memref<1x32xf32, #tpu.memory_space<vmem>>, %arg5: memref<32x32xf32, #tpu.memory_space<vmem>>, %arg6: memref<1x32xf32, #tpu.memory_space<vmem>>, %arg7: memref<32x32xf32, #tpu.memory_space<vmem>>, %arg8: memref<1x32xf32, #tpu.memory_space<vmem>>, %arg9: memref<4x8x32xf32, #tpu.memory_space<vmem>>, %arg10: memref<1x32xf32, #tpu.memory_space<vmem>>, %arg11: memref<32x64xf32, #tpu.memory_space<vmem>>, %arg12: memref<1x64xf32, #tpu.memory_space<vmem>>, %arg13: memref<64x32xf32, #tpu.memory_space<vmem>>, %arg14: memref<1x32xf32, #tpu.memory_space<vmem>>, %arg15: memref<1x32xf32, #tpu.memory_space<vmem>>, %arg16: memref<1x32xf32, #tpu.memory_space<vmem>>, %arg17: memref<1x32xf32, #tpu.memory_space<vmem>>, %arg18: memref<1x32xf32, #tpu.memory_space<vmem>>, %arg19: memref<16x32xf32, #tpu.memory_space<vmem>>) attributes {dimension_semantics = [#tpu.dimension_semantics<parallel>], iteration_bounds = array<i64: 1>, scalar_prefetch = 0 : i64, scratch_operands = 0 : i64, tpu.core_type = #tpu.core_type<tc>, window_params = [{transform_indices = @transform_0, window_bounds = array<i64: 16, 32>}, {pipeline_mode = #tpu.pipeline_mode<synchronous>, transform_indices = @transform_1, window_bounds = array<i64: 16, 16>}, {pipeline_mode = #tpu.pipeline_mode<synchronous>, transform_indices = @transform_2, window_bounds = array<i64: 32, 32>}, {pipeline_mode = #tpu.pipeline_mode<synchronous>, transform_indices = @transform_3, window_bounds = array<i64: 1, 32>}, {pipeline_mode = #tpu.pipeline_mode<synchronous>, transform_indices = @transform_4, window_bounds = array<i64: 32, 32>}, {pipeline_mode = #tpu.pipeline_mode<synchronous>, transform_indices = @transform_5, window_bounds = array<i64: 1, 32>}, {pipeline_mode = #tpu.pipeline_mode<synchronous>, transform_indices = @transform_6, window_bounds = array<i64: 32, 32>}, {pipeline_mode = #tpu.pipeline_mode<synchronous>, transform_indices = @transform_7, window_bounds = array<i64: 1, 32>}, {pipeline_mode = #tpu.pipeline_mode<synchronous>, transform_indices = @transform_8, window_bounds = array<i64: 4, 8, 32>}, {pipeline_mode = #tpu.pipeline_mode<synchronous>, transform_indices = @transform_9, window_bounds = array<i64: 1, 32>}, {pipeline_mode = #tpu.pipeline_mode<synchronous>, transform_indices = @transform_10, window_bounds = array<i64: 32, 64>}, {pipeline_mode = #tpu.pipeline_mode<synchronous>, transform_indices = @transform_11, window_bounds = array<i64: 1, 64>}, {pipeline_mode = #tpu.pipeline_mode<synchronous>, transform_indices = @transform_12, window_bounds = array<i64: 64, 32>}, {pipeline_mode = #tpu.pipeline_mode<synchronous>, transform_indices = @transform_13, window_bounds = array<i64: 1, 32>}, {pipeline_mode = #tpu.pipeline_mode<synchronous>, transform_indices = @transform_14, window_bounds = array<i64: 1, 32>}, {pipeline_mode = #tpu.pipeline_mode<synchronous>, transform_indices = @transform_15, window_bounds = array<i64: 1, 32>}, {pipeline_mode = #tpu.pipeline_mode<synchronous>, transform_indices = @transform_16, window_bounds = array<i64: 1, 32>}, {pipeline_mode = #tpu.pipeline_mode<synchronous>, transform_indices = @transform_17, window_bounds = array<i64: 1, 32>}, {transform_indices = @transform_18, window_bounds = array<i64: 16, 32>}]} {
    %c0 = arith.constant 0 : index
    %c0_0 = arith.constant 0 : index
    %0 = vector.load %arg1[%c0, %c0_0] : memref<16x32xf32, #tpu.memory_space<vmem>>, vector<16x32xf32>
    %c0_1 = arith.constant 0 : index
    %c0_2 = arith.constant 0 : index
    %1 = vector.load %arg2[%c0_1, %c0_2] : memref<16x16xf32, #tpu.memory_space<vmem>>, vector<16x16xf32>
    %c0_3 = arith.constant 0 : index
    %c0_4 = arith.constant 0 : index
    %2 = vector.load %arg3[%c0_3, %c0_4] : memref<32x32xf32, #tpu.memory_space<vmem>>, vector<32x32xf32>
    %cst = arith.constant dense<0.000000e+00> : vector<16x32xf32>
    %3 = tpu.matmul %0, %2, %cst {dimension_numbers = #tpu.dot_dimension_numbers<[1], [0], [0], [1], [0, 0, 1, 1], [], []>} : vector<16x32xf32>, vector<32x32xf32>, vector<16x32xf32> -> vector<16x32xf32>
    %c0_5 = arith.constant 0 : index
    %c0_6 = arith.constant 0 : index
    %4 = vector.load %arg4[%c0_5, %c0_6] : memref<1x32xf32, #tpu.memory_space<vmem>>, vector<1x32xf32>
    %5 = vector.broadcast %4 : vector<1x32xf32> to vector<16x32xf32>
    %6 = arith.addf %3, %5 : vector<16x32xf32>
    %c0_7 = arith.constant 0 : index
    %c0_8 = arith.constant 0 : index
    %7 = vector.load %arg5[%c0_7, %c0_8] : memref<32x32xf32, #tpu.memory_space<vmem>>, vector<32x32xf32>
    %cst_9 = arith.constant dense<0.000000e+00> : vector<16x32xf32>
    %8 = tpu.matmul %0, %7, %cst_9 {dimension_numbers = #tpu.dot_dimension_numbers<[1], [0], [0], [1], [0, 0, 1, 1], [], []>} : vector<16x32xf32>, vector<32x32xf32>, vector<16x32xf32> -> vector<16x32xf32>
    %c0_10 = arith.constant 0 : index
    %c0_11 = arith.constant 0 : index
    %9 = vector.load %arg6[%c0_10, %c0_11] : memref<1x32xf32, #tpu.memory_space<vmem>>, vector<1x32xf32>
    %10 = vector.broadcast %9 : vector<1x32xf32> to vector<16x32xf32>
    %11 = arith.addf %8, %10 : vector<16x32xf32>
    %c0_12 = arith.constant 0 : index
    %c0_13 = arith.constant 0 : index
    %12 = vector.load %arg7[%c0_12, %c0_13] : memref<32x32xf32, #tpu.memory_space<vmem>>, vector<32x32xf32>
    %cst_14 = arith.constant dense<0.000000e+00> : vector<16x32xf32>
    %13 = tpu.matmul %0, %12, %cst_14 {dimension_numbers = #tpu.dot_dimension_numbers<[1], [0], [0], [1], [0, 0, 1, 1], [], []>} : vector<16x32xf32>, vector<32x32xf32>, vector<16x32xf32> -> vector<16x32xf32>
    %c0_15 = arith.constant 0 : index
    %c0_16 = arith.constant 0 : index
    %14 = vector.load %arg8[%c0_15, %c0_16] : memref<1x32xf32, #tpu.memory_space<vmem>>, vector<1x32xf32>
    %15 = vector.broadcast %14 : vector<1x32xf32> to vector<16x32xf32>
    %16 = arith.addf %13, %15 : vector<16x32xf32>
    %cst_17 = arith.constant 0.000000e+00 : f32
    %17 = vector.broadcast %cst_17 : f32 to vector<16x32xf32>
    %18 = vector.extract_strided_slice %6 {offsets = [0, 0], sizes = [16, 8], strides = [1, 1]} : vector<16x32xf32> to vector<16x8xf32>
    %19 = vector.extract_strided_slice %11 {offsets = [0, 0], sizes = [16, 8], strides = [1, 1]} : vector<16x32xf32> to vector<16x8xf32>
    %20 = vector.extract_strided_slice %16 {offsets = [0, 0], sizes = [16, 8], strides = [1, 1]} : vector<16x32xf32> to vector<16x8xf32>
    %21 = tpu.transpose %19, [1, 0] : vector<16x8xf32> -> vector<8x16xf32>
    %cst_18 = arith.constant dense<0.000000e+00> : vector<16x16xf32>
    %22 = tpu.matmul %18, %21, %cst_18 {dimension_numbers = #tpu.dot_dimension_numbers<[1], [0], [0], [1], [0, 0, 1, 1], [], []>} : vector<16x8xf32>, vector<8x16xf32>, vector<16x16xf32> -> vector<16x16xf32>
    %cst_19 = arith.constant 0.353553385 : f32
    %23 = vector.broadcast %cst_19 : f32 to vector<16x16xf32>
    %24 = arith.mulf %22, %23 : vector<16x16xf32>
    %25 = arith.addf %24, %1 : vector<16x16xf32>
    %cst_20 = arith.constant dense<0xFF800000> : vector<16xf32>
    %26 = vector.multi_reduction <maximumf>, %25, %cst_20 [1] : vector<16x16xf32> to vector<16xf32>
    %27 = vector.shape_cast %26 : vector<16xf32> to vector<16x1xf32>
    %28 = vector.broadcast %27 : vector<16x1xf32> to vector<16x16xf32>
    %29 = arith.subf %25, %28 : vector<16x16xf32>
    %30 = math.exp %29 : vector<16x16xf32>
    %cst_21 = arith.constant dense<0.000000e+00> : vector<16xf32>
    %31 = vector.multi_reduction <add>, %30, %cst_21 [1] : vector<16x16xf32> to vector<16xf32>
    %32 = vector.shape_cast %31 : vector<16xf32> to vector<16x1xf32>
    %33 = tpu.reciprocal %32 {approx = true} : vector<16x1xf32> -> vector<16x1xf32>
    %34 = vector.broadcast %33 : vector<16x1xf32> to vector<16x16xf32>
    %35 = arith.mulf %30, %34 : vector<16x16xf32>
    %cst_22 = arith.constant dense<0.000000e+00> : vector<16x8xf32>
    %36 = tpu.matmul %35, %20, %cst_22 {dimension_numbers = #tpu.dot_dimension_numbers<[1], [0], [0], [1], [0, 0, 1, 1], [], []>} : vector<16x16xf32>, vector<16x8xf32>, vector<16x8xf32> -> vector<16x8xf32>
    %c0_23 = arith.constant 0 : index
    %c0_24 = arith.constant 0 : index
    %c0_25 = arith.constant 0 : index
    %37 = vector.load %arg9[%c0_23, %c0_24, %c0_25] : memref<4x8x32xf32, #tpu.memory_space<vmem>>, vector<1x8x32xf32>
    %38 = vector.shape_cast %37 : vector<1x8x32xf32> to vector<8x32xf32>
    %cst_26 = arith.constant dense<0.000000e+00> : vector<16x32xf32>
    %39 = tpu.matmul %36, %38, %cst_26 {dimension_numbers = #tpu.dot_dimension_numbers<[1], [0], [0], [1], [0, 0, 1, 1], [], []>} : vector<16x8xf32>, vector<8x32xf32>, vector<16x32xf32> -> vector<16x32xf32>
    %40 = arith.addf %17, %39 : vector<16x32xf32>
    %41 = vector.extract_strided_slice %6 {offsets = [0, 8], sizes = [16, 8], strides = [1, 1]} : vector<16x32xf32> to vector<16x8xf32>
    %42 = vector.extract_strided_slice %11 {offsets = [0, 8], sizes = [16, 8], strides = [1, 1]} : vector<16x32xf32> to vector<16x8xf32>
    %43 = vector.extract_strided_slice %16 {offsets = [0, 8], sizes = [16, 8], strides = [1, 1]} : vector<16x32xf32> to vector<16x8xf32>
    %44 = tpu.transpose %42, [1, 0] : vector<16x8xf32> -> vector<8x16xf32>
    %cst_27 = arith.constant dense<0.000000e+00> : vector<16x16xf32>
    %45 = tpu.matmul %41, %44, %cst_27 {dimension_numbers = #tpu.dot_dimension_numbers<[1], [0], [0], [1], [0, 0, 1, 1], [], []>} : vector<16x8xf32>, vector<8x16xf32>, vector<16x16xf32> -> vector<16x16xf32>
    %cst_28 = arith.constant 0.353553385 : f32
    %46 = vector.broadcast %cst_28 : f32 to vector<16x16xf32>
    %47 = arith.mulf %45, %46 : vector<16x16xf32>
    %48 = arith.addf %47, %1 : vector<16x16xf32>
    %cst_29 = arith.constant dense<0xFF800000> : vector<16xf32>
    %49 = vector.multi_reduction <maximumf>, %48, %cst_29 [1] : vector<16x16xf32> to vector<16xf32>
    %50 = vector.shape_cast %49 : vector<16xf32> to vector<16x1xf32>
    %51 = vector.broadcast %50 : vector<16x1xf32> to vector<16x16xf32>
    %52 = arith.subf %48, %51 : vector<16x16xf32>
    %53 = math.exp %52 : vector<16x16xf32>
    %cst_30 = arith.constant dense<0.000000e+00> : vector<16xf32>
    %54 = vector.multi_reduction <add>, %53, %cst_30 [1] : vector<16x16xf32> to vector<16xf32>
    %55 = vector.shape_cast %54 : vector<16xf32> to vector<16x1xf32>
    %56 = tpu.reciprocal %55 {approx = true} : vector<16x1xf32> -> vector<16x1xf32>
    %57 = vector.broadcast %56 : vector<16x1xf32> to vector<16x16xf32>
    %58 = arith.mulf %53, %57 : vector<16x16xf32>
    %cst_31 = arith.constant dense<0.000000e+00> : vector<16x8xf32>
    %59 = tpu.matmul %58, %43, %cst_31 {dimension_numbers = #tpu.dot_dimension_numbers<[1], [0], [0], [1], [0, 0, 1, 1], [], []>} : vector<16x16xf32>, vector<16x8xf32>, vector<16x8xf32> -> vector<16x8xf32>
    %c1 = arith.constant 1 : index
    %c0_32 = arith.constant 0 : index
    %c0_33 = arith.constant 0 : index
    %60 = vector.load %arg9[%c1, %c0_32, %c0_33] : memref<4x8x32xf32, #tpu.memory_space<vmem>>, vector<1x8x32xf32>
    %61 = vector.shape_cast %60 : vector<1x8x32xf32> to vector<8x32xf32>
    %cst_34 = arith.constant dense<0.000000e+00> : vector<16x32xf32>
    %62 = tpu.matmul %59, %61, %cst_34 {dimension_numbers = #tpu.dot_dimension_numbers<[1], [0], [0], [1], [0, 0, 1, 1], [], []>} : vector<16x8xf32>, vector<8x32xf32>, vector<16x32xf32> -> vector<16x32xf32>
    %63 = arith.addf %40, %62 : vector<16x32xf32>
    %64 = vector.extract_strided_slice %6 {offsets = [0, 16], sizes = [16, 8], strides = [1, 1]} : vector<16x32xf32> to vector<16x8xf32>
    %65 = vector.extract_strided_slice %11 {offsets = [0, 16], sizes = [16, 8], strides = [1, 1]} : vector<16x32xf32> to vector<16x8xf32>
    %66 = vector.extract_strided_slice %16 {offsets = [0, 16], sizes = [16, 8], strides = [1, 1]} : vector<16x32xf32> to vector<16x8xf32>
    %67 = tpu.transpose %65, [1, 0] : vector<16x8xf32> -> vector<8x16xf32>
    %cst_35 = arith.constant dense<0.000000e+00> : vector<16x16xf32>
    %68 = tpu.matmul %64, %67, %cst_35 {dimension_numbers = #tpu.dot_dimension_numbers<[1], [0], [0], [1], [0, 0, 1, 1], [], []>} : vector<16x8xf32>, vector<8x16xf32>, vector<16x16xf32> -> vector<16x16xf32>
    %cst_36 = arith.constant 0.353553385 : f32
    %69 = vector.broadcast %cst_36 : f32 to vector<16x16xf32>
    %70 = arith.mulf %68, %69 : vector<16x16xf32>
    %71 = arith.addf %70, %1 : vector<16x16xf32>
    %cst_37 = arith.constant dense<0xFF800000> : vector<16xf32>
    %72 = vector.multi_reduction <maximumf>, %71, %cst_37 [1] : vector<16x16xf32> to vector<16xf32>
    %73 = vector.shape_cast %72 : vector<16xf32> to vector<16x1xf32>
    %74 = vector.broadcast %73 : vector<16x1xf32> to vector<16x16xf32>
    %75 = arith.subf %71, %74 : vector<16x16xf32>
    %76 = math.exp %75 : vector<16x16xf32>
    %cst_38 = arith.constant dense<0.000000e+00> : vector<16xf32>
    %77 = vector.multi_reduction <add>, %76, %cst_38 [1] : vector<16x16xf32> to vector<16xf32>
    %78 = vector.shape_cast %77 : vector<16xf32> to vector<16x1xf32>
    %79 = tpu.reciprocal %78 {approx = true} : vector<16x1xf32> -> vector<16x1xf32>
    %80 = vector.broadcast %79 : vector<16x1xf32> to vector<16x16xf32>
    %81 = arith.mulf %76, %80 : vector<16x16xf32>
    %cst_39 = arith.constant dense<0.000000e+00> : vector<16x8xf32>
    %82 = tpu.matmul %81, %66, %cst_39 {dimension_numbers = #tpu.dot_dimension_numbers<[1], [0], [0], [1], [0, 0, 1, 1], [], []>} : vector<16x16xf32>, vector<16x8xf32>, vector<16x8xf32> -> vector<16x8xf32>
    %c2 = arith.constant 2 : index
    %c0_40 = arith.constant 0 : index
    %c0_41 = arith.constant 0 : index
    %83 = vector.load %arg9[%c2, %c0_40, %c0_41] : memref<4x8x32xf32, #tpu.memory_space<vmem>>, vector<1x8x32xf32>
    %84 = vector.shape_cast %83 : vector<1x8x32xf32> to vector<8x32xf32>
    %cst_42 = arith.constant dense<0.000000e+00> : vector<16x32xf32>
    %85 = tpu.matmul %82, %84, %cst_42 {dimension_numbers = #tpu.dot_dimension_numbers<[1], [0], [0], [1], [0, 0, 1, 1], [], []>} : vector<16x8xf32>, vector<8x32xf32>, vector<16x32xf32> -> vector<16x32xf32>
    %86 = arith.addf %63, %85 : vector<16x32xf32>
    %87 = vector.extract_strided_slice %6 {offsets = [0, 24], sizes = [16, 8], strides = [1, 1]} : vector<16x32xf32> to vector<16x8xf32>
    %88 = vector.extract_strided_slice %11 {offsets = [0, 24], sizes = [16, 8], strides = [1, 1]} : vector<16x32xf32> to vector<16x8xf32>
    %89 = vector.extract_strided_slice %16 {offsets = [0, 24], sizes = [16, 8], strides = [1, 1]} : vector<16x32xf32> to vector<16x8xf32>
    %90 = tpu.transpose %88, [1, 0] : vector<16x8xf32> -> vector<8x16xf32>
    %cst_43 = arith.constant dense<0.000000e+00> : vector<16x16xf32>
    %91 = tpu.matmul %87, %90, %cst_43 {dimension_numbers = #tpu.dot_dimension_numbers<[1], [0], [0], [1], [0, 0, 1, 1], [], []>} : vector<16x8xf32>, vector<8x16xf32>, vector<16x16xf32> -> vector<16x16xf32>
    %cst_44 = arith.constant 0.353553385 : f32
    %92 = vector.broadcast %cst_44 : f32 to vector<16x16xf32>
    %93 = arith.mulf %91, %92 : vector<16x16xf32>
    %94 = arith.addf %93, %1 : vector<16x16xf32>
    %cst_45 = arith.constant dense<0xFF800000> : vector<16xf32>
    %95 = vector.multi_reduction <maximumf>, %94, %cst_45 [1] : vector<16x16xf32> to vector<16xf32>
    %96 = vector.shape_cast %95 : vector<16xf32> to vector<16x1xf32>
    %97 = vector.broadcast %96 : vector<16x1xf32> to vector<16x16xf32>
    %98 = arith.subf %94, %97 : vector<16x16xf32>
    %99 = math.exp %98 : vector<16x16xf32>
    %cst_46 = arith.constant dense<0.000000e+00> : vector<16xf32>
    %100 = vector.multi_reduction <add>, %99, %cst_46 [1] : vector<16x16xf32> to vector<16xf32>
    %101 = vector.shape_cast %100 : vector<16xf32> to vector<16x1xf32>
    %102 = tpu.reciprocal %101 {approx = true} : vector<16x1xf32> -> vector<16x1xf32>
    %103 = vector.broadcast %102 : vector<16x1xf32> to vector<16x16xf32>
    %104 = arith.mulf %99, %103 : vector<16x16xf32>
    %cst_47 = arith.constant dense<0.000000e+00> : vector<16x8xf32>
    %105 = tpu.matmul %104, %89, %cst_47 {dimension_numbers = #tpu.dot_dimension_numbers<[1], [0], [0], [1], [0, 0, 1, 1], [], []>} : vector<16x16xf32>, vector<16x8xf32>, vector<16x8xf32> -> vector<16x8xf32>
    %c3 = arith.constant 3 : index
    %c0_48 = arith.constant 0 : index
    %c0_49 = arith.constant 0 : index
    %106 = vector.load %arg9[%c3, %c0_48, %c0_49] : memref<4x8x32xf32, #tpu.memory_space<vmem>>, vector<1x8x32xf32>
    %107 = vector.shape_cast %106 : vector<1x8x32xf32> to vector<8x32xf32>
    %cst_50 = arith.constant dense<0.000000e+00> : vector<16x32xf32>
    %108 = tpu.matmul %105, %107, %cst_50 {dimension_numbers = #tpu.dot_dimension_numbers<[1], [0], [0], [1], [0, 0, 1, 1], [], []>} : vector<16x8xf32>, vector<8x32xf32>, vector<16x32xf32> -> vector<16x32xf32>
    %109 = arith.addf %86, %108 : vector<16x32xf32>
    %c0_51 = arith.constant 0 : index
    %c0_52 = arith.constant 0 : index
    %110 = vector.load %arg10[%c0_51, %c0_52] : memref<1x32xf32, #tpu.memory_space<vmem>>, vector<1x32xf32>
    %111 = vector.broadcast %110 : vector<1x32xf32> to vector<16x32xf32>
    %112 = arith.addf %109, %111 : vector<16x32xf32>
    %113 = arith.addf %0, %112 : vector<16x32xf32>
    %cst_53 = arith.constant dense<0.000000e+00> : vector<16xf32>
    %114 = vector.multi_reduction <add>, %113, %cst_53 [1] : vector<16x32xf32> to vector<16xf32>
    %115 = vector.shape_cast %114 : vector<16xf32> to vector<16x1xf32>
    %cst_54 = arith.constant 3.200000e+01 : f32
    %116 = vector.broadcast %cst_54 : f32 to vector<16x1xf32>
    %117 = arith.divf %115, %116 : vector<16x1xf32>
    %118 = vector.broadcast %117 : vector<16x1xf32> to vector<16x32xf32>
    %119 = arith.subf %113, %118 : vector<16x32xf32>
    %120 = arith.mulf %119, %119 : vector<16x32xf32>
    %cst_55 = arith.constant dense<0.000000e+00> : vector<16xf32>
    %121 = vector.multi_reduction <add>, %120, %cst_55 [1] : vector<16x32xf32> to vector<16xf32>
    %122 = vector.shape_cast %121 : vector<16xf32> to vector<16x1xf32>
    %cst_56 = arith.constant 3.200000e+01 : f32
    %123 = vector.broadcast %cst_56 : f32 to vector<16x1xf32>
    %124 = arith.divf %122, %123 : vector<16x1xf32>
    %125 = vector.broadcast %117 : vector<16x1xf32> to vector<16x32xf32>
    %126 = arith.subf %113, %125 : vector<16x32xf32>
    %cst_57 = arith.constant 9.99999974E-6 : f32
    %127 = vector.broadcast %cst_57 : f32 to vector<16x1xf32>
    %128 = arith.addf %124, %127 : vector<16x1xf32>
    %129 = math.rsqrt %128 : vector<16x1xf32>
    %130 = vector.broadcast %129 : vector<16x1xf32> to vector<16x32xf32>
    %131 = arith.mulf %126, %130 : vector<16x32xf32>
    %c0_58 = arith.constant 0 : index
    %c0_59 = arith.constant 0 : index
    %132 = vector.load %arg15[%c0_58, %c0_59] : memref<1x32xf32, #tpu.memory_space<vmem>>, vector<1x32xf32>
    %133 = vector.broadcast %132 : vector<1x32xf32> to vector<16x32xf32>
    %134 = arith.mulf %131, %133 : vector<16x32xf32>
    %c0_60 = arith.constant 0 : index
    %c0_61 = arith.constant 0 : index
    %135 = vector.load %arg16[%c0_60, %c0_61] : memref<1x32xf32, #tpu.memory_space<vmem>>, vector<1x32xf32>
    %136 = vector.broadcast %135 : vector<1x32xf32> to vector<16x32xf32>
    %137 = arith.addf %134, %136 : vector<16x32xf32>
    %c0_62 = arith.constant 0 : index
    %c0_63 = arith.constant 0 : index
    %138 = vector.load %arg11[%c0_62, %c0_63] : memref<32x64xf32, #tpu.memory_space<vmem>>, vector<32x64xf32>
    %cst_64 = arith.constant dense<0.000000e+00> : vector<16x64xf32>
    %139 = tpu.matmul %137, %138, %cst_64 {dimension_numbers = #tpu.dot_dimension_numbers<[1], [0], [0], [1], [0, 0, 1, 1], [], []>} : vector<16x32xf32>, vector<32x64xf32>, vector<16x64xf32> -> vector<16x64xf32>
    %c0_65 = arith.constant 0 : index
    %c0_66 = arith.constant 0 : index
    %140 = vector.load %arg12[%c0_65, %c0_66] : memref<1x64xf32, #tpu.memory_space<vmem>>, vector<1x64xf32>
    %141 = vector.broadcast %140 : vector<1x64xf32> to vector<16x64xf32>
    %142 = arith.addf %139, %141 : vector<16x64xf32>
    %cst_67 = arith.constant 0.000000e+00 : f32
    %143 = vector.broadcast %cst_67 : f32 to vector<16x64xf32>
    %144 = arith.maximumf %142, %143 : vector<16x64xf32>
    %c0_68 = arith.constant 0 : index
    %c0_69 = arith.constant 0 : index
    %145 = vector.load %arg13[%c0_68, %c0_69] : memref<64x32xf32, #tpu.memory_space<vmem>>, vector<64x32xf32>
    %cst_70 = arith.constant dense<0.000000e+00> : vector<16x32xf32>
    %146 = tpu.matmul %144, %145, %cst_70 {dimension_numbers = #tpu.dot_dimension_numbers<[1], [0], [0], [1], [0, 0, 1, 1], [], []>} : vector<16x64xf32>, vector<64x32xf32>, vector<16x32xf32> -> vector<16x32xf32>
    %c0_71 = arith.constant 0 : index
    %c0_72 = arith.constant 0 : index
    %147 = vector.load %arg14[%c0_71, %c0_72] : memref<1x32xf32, #tpu.memory_space<vmem>>, vector<1x32xf32>
    %148 = vector.broadcast %147 : vector<1x32xf32> to vector<16x32xf32>
    %149 = arith.addf %146, %148 : vector<16x32xf32>
    %150 = arith.addf %137, %149 : vector<16x32xf32>
    %cst_73 = arith.constant dense<0.000000e+00> : vector<16xf32>
    %151 = vector.multi_reduction <add>, %150, %cst_73 [1] : vector<16x32xf32> to vector<16xf32>
    %152 = vector.shape_cast %151 : vector<16xf32> to vector<16x1xf32>
    %cst_74 = arith.constant 3.200000e+01 : f32
    %153 = vector.broadcast %cst_74 : f32 to vector<16x1xf32>
    %154 = arith.divf %152, %153 : vector<16x1xf32>
    %155 = vector.broadcast %154 : vector<16x1xf32> to vector<16x32xf32>
    %156 = arith.subf %150, %155 : vector<16x32xf32>
    %157 = arith.mulf %156, %156 : vector<16x32xf32>
    %cst_75 = arith.constant dense<0.000000e+00> : vector<16xf32>
    %158 = vector.multi_reduction <add>, %157, %cst_75 [1] : vector<16x32xf32> to vector<16xf32>
    %159 = vector.shape_cast %158 : vector<16xf32> to vector<16x1xf32>
    %cst_76 = arith.constant 3.200000e+01 : f32
    %160 = vector.broadcast %cst_76 : f32 to vector<16x1xf32>
    %161 = arith.divf %159, %160 : vector<16x1xf32>
    %162 = vector.broadcast %154 : vector<16x1xf32> to vector<16x32xf32>
    %163 = arith.subf %150, %162 : vector<16x32xf32>
    %cst_77 = arith.constant 9.99999974E-6 : f32
    %164 = vector.broadcast %cst_77 : f32 to vector<16x1xf32>
    %165 = arith.addf %161, %164 : vector<16x1xf32>
    %166 = math.rsqrt %165 : vector<16x1xf32>
    %167 = vector.broadcast %166 : vector<16x1xf32> to vector<16x32xf32>
    %168 = arith.mulf %163, %167 : vector<16x32xf32>
    %c0_78 = arith.constant 0 : index
    %c0_79 = arith.constant 0 : index
    %169 = vector.load %arg17[%c0_78, %c0_79] : memref<1x32xf32, #tpu.memory_space<vmem>>, vector<1x32xf32>
    %170 = vector.broadcast %169 : vector<1x32xf32> to vector<16x32xf32>
    %171 = arith.mulf %168, %170 : vector<16x32xf32>
    %c0_80 = arith.constant 0 : index
    %c0_81 = arith.constant 0 : index
    %172 = vector.load %arg18[%c0_80, %c0_81] : memref<1x32xf32, #tpu.memory_space<vmem>>, vector<1x32xf32>
    %173 = vector.broadcast %172 : vector<1x32xf32> to vector<16x32xf32>
    %174 = arith.addf %171, %173 : vector<16x32xf32>
    %c0_82 = arith.constant 0 : index
    %c0_83 = arith.constant 0 : index
    %175 = vector.load %arg19[%c0_82, %c0_83] : memref<16x32xf32, #tpu.memory_space<vmem>>, vector<16x32xf32>
    tpu.vector_store %arg19[%c0_82, %c0_83], %174 {strides = array<i32>} : memref<16x32xf32, #tpu.memory_space<vmem>>, vector<16x32xf32>,
    return
  }
  func.func @transform_0(%arg0: i32) -> (i32, i32) {
    %c0_i32 = arith.constant 0 : i32
    %c0_i32_0 = arith.constant 0 : i32
    return %arg0, %c0_i32 : i32, i32
  }
  func.func @transform_1(%arg0: i32) -> (i32, i32) {
    %c0_i32 = arith.constant 0 : i32
    %c0_i32_0 = arith.constant 0 : i32
    %c0_i32_1 = arith.constant 0 : i32
    return %c0_i32, %c0_i32_0 : i32, i32
  }
  func.func @transform_2(%arg0: i32) -> (i32, i32) {
    %c0_i32 = arith.constant 0 : i32
    %c0_i32_0 = arith.constant 0 : i32
    %c0_i32_1 = arith.constant 0 : i32
    return %c0_i32, %c0_i32_0 : i32, i32
  }
  func.func @transform_3(%arg0: i32) -> (i32, i32) {
    %c0_i32 = arith.constant 0 : i32
    %c0_i32_0 = arith.constant 0 : i32
    %c0_i32_1 = arith.constant 0 : i32
    return %c0_i32, %c0_i32_0 : i32, i32
  }
  func.func @transform_4(%arg0: i32) -> (i32, i32) {
    %c0_i32 = arith.constant 0 : i32
    %c0_i32_0 = arith.constant 0 : i32
    %c0_i32_1 = arith.constant 0 : i32
    return %c0_i32, %c0_i32_0 : i32, i32
  }
  func.func @transform_5(%arg0: i32) -> (i32, i32) {
    %c0_i32 = arith.constant 0 : i32
    %c0_i32_0 = arith.constant 0 : i32
    %c0_i32_1 = arith.constant 0 : i32
    return %c0_i32, %c0_i32_0 : i32, i32
  }
  func.func @transform_6(%arg0: i32) -> (i32, i32) {
    %c0_i32 = arith.constant 0 : i32
    %c0_i32_0 = arith.constant 0 : i32
    %c0_i32_1 = arith.constant 0 : i32
    return %c0_i32, %c0_i32_0 : i32, i32
  }
  func.func @transform_7(%arg0: i32) -> (i32, i32) {
    %c0_i32 = arith.constant 0 : i32
    %c0_i32_0 = arith.constant 0 : i32
    %c0_i32_1 = arith.constant 0 : i32
    return %c0_i32, %c0_i32_0 : i32, i32
  }
  func.func @transform_8(%arg0: i32) -> (i32, i32, i32) {
    %c0_i32 = arith.constant 0 : i32
    %c0_i32_0 = arith.constant 0 : i32
    %c0_i32_1 = arith.constant 0 : i32
    %c0_i32_2 = arith.constant 0 : i32
    return %c0_i32, %c0_i32_0, %c0_i32_1 : i32, i32, i32
  }
  func.func @transform_9(%arg0: i32) -> (i32, i32) {
    %c0_i32 = arith.constant 0 : i32
    %c0_i32_0 = arith.constant 0 : i32
    %c0_i32_1 = arith.constant 0 : i32
    return %c0_i32, %c0_i32_0 : i32, i32
  }
  func.func @transform_10(%arg0: i32) -> (i32, i32) {
    %c0_i32 = arith.constant 0 : i32
    %c0_i32_0 = arith.constant 0 : i32
    %c0_i32_1 = arith.constant 0 : i32
    return %c0_i32, %c0_i32_0 : i32, i32
  }
  func.func @transform_11(%arg0: i32) -> (i32, i32) {
    %c0_i32 = arith.constant 0 : i32
    %c0_i32_0 = arith.constant 0 : i32
    %c0_i32_1 = arith.constant 0 : i32
    return %c0_i32, %c0_i32_0 : i32, i32
  }
  func.func @transform_12(%arg0: i32) -> (i32, i32) {
    %c0_i32 = arith.constant 0 : i32
    %c0_i32_0 = arith.constant 0 : i32
    %c0_i32_1 = arith.constant 0 : i32
    return %c0_i32, %c0_i32_0 : i32, i32
  }
  func.func @transform_13(%arg0: i32) -> (i32, i32) {
    %c0_i32 = arith.constant 0 : i32
    %c0_i32_0 = arith.constant 0 : i32
    %c0_i32_1 = arith.constant 0 : i32
    return %c0_i32, %c0_i32_0 : i32, i32
  }
  func.func @transform_14(%arg0: i32) -> (i32, i32) {
    %c0_i32 = arith.constant 0 : i32
    %c0_i32_0 = arith.constant 0 : i32
    %c0_i32_1 = arith.constant 0 : i32
    return %c0_i32, %c0_i32_0 : i32, i32
  }
  func.func @transform_15(%arg0: i32) -> (i32, i32) {
    %c0_i32 = arith.constant 0 : i32
    %c0_i32_0 = arith.constant 0 : i32
    %c0_i32_1 = arith.constant 0 : i32
    return %c0_i32, %c0_i32_0 : i32, i32
  }
  func.func @transform_16(%arg0: i32) -> (i32, i32) {
    %c0_i32 = arith.constant 0 : i32
    %c0_i32_0 = arith.constant 0 : i32
    %c0_i32_1 = arith.constant 0 : i32
    return %c0_i32, %c0_i32_0 : i32, i32
  }
  func.func @transform_17(%arg0: i32) -> (i32, i32) {
    %c0_i32 = arith.constant 0 : i32
    %c0_i32_0 = arith.constant 0 : i32
    %c0_i32_1 = arith.constant 0 : i32
    return %c0_i32, %c0_i32_0 : i32, i32
  }
  func.func @transform_18(%arg0: i32) -> (i32, i32) {
    %c0_i32 = arith.constant 0 : i32
    %c0_i32_0 = arith.constant 0 : i32
    return %arg0, %c0_i32 : i32, i32
  }
}

</mosaic_0001>

<bundles_post_ra>
// kernel: encoder_layer.1
= control target key start
LH: loop header
LB: loop body
LE: loop exit
PB: predicated region body
PF: predicated region fallthrough
CT: control target
= control target key end

     0   :  { %s1917_s0 = inlined_call_operand.hbm [shape: f32[16,32], index: 0, kind: input, shape index: {}]   ;;  %s1918_s1 = inlined_call_operand.vmem [shape: f32[16,16], index: 1, kind: input, shape index: {}]   ;;  %s1919_s2 = inlined_call_operand.vmem [shape: f32[32,32], index: 2, kind: input, shape index: {}]   ;;  %s1920_s3 = inlined_call_operand.vmem [shape: f32[1,32], index: 3, kind: input, shape index: {}]   ;;  %s1921_s4 = inlined_call_operand.vmem [shape: f32[32,32], index: 4, kind: input, shape index: {}]   ;;  %s1922_s5 = inlined_call_operand.hbm [shape: f32[1,32], index: 5, kind: input, shape index: {}]   ;;  %s1923_s6 = inlined_call_operand.vmem [shape: f32[32,32], index: 6, kind: input, shape index: {}]   ;;  %s1924_s7 = inlined_call_operand.hbm [shape: f32[1,32], index: 7, kind: input, shape index: {}]   ;;  %s1925_s8 = inlined_call_operand.hbm [shape: f32[4,8,32], index: 8, kind: input, shape index: {}]   ;;  %s1926_s9 = inlined_call_operand.hbm [shape: f32[1,32], index: 9, kind: input, shape index: {}]   ;;  %s1927_s10 = inlined_call_operand.hbm [shape: f32[32,64], index: 10, kind: input, shape index: {}]   ;;  %s1928_s11 = inlined_call_operand.hbm [shape: f32[1,64], index: 11, kind: input, shape index: {}]   ;;  %s1929_s12 = inlined_call_operand.vmem [shape: f32[64,32], index: 12, kind: input, shape index: {}]   ;;  %s1930_s13 = inlined_call_operand.hbm [shape: f32[1,32], index: 13, kind: input, shape index: {}]   ;;  %s1931_s14 = inlined_call_operand.hbm [shape: f32[1,32], index: 14, kind: input, shape index: {}]   ;;  %s1932_s15 = inlined_call_operand.hbm [shape: f32[1,32], index: 15, kind: input, shape index: {}]   ;;  %s1933_s16 = inlined_call_operand.hbm [shape: f32[1,32], index: 16, kind: input, shape index: {}]   ;;  %s1934_s17 = inlined_call_operand.hbm [shape: f32[1,32], index: 17, kind: input, shape index: {}]   ;;  %s1935_s18 = inlined_call_operand.hbm [shape: f32[16,32], index: 18, kind: output, shape index: {}]  }
   0x1   :  { %1938 = sst [smem:[#allocation31_spill]] %s1917_s0 }
   0x2   :  { %1939 = sst [smem:[#allocation32_spill]] %s1918_s1 }
   0x3   :  { %1940 = sst [smem:[#allocation33_spill]] %s1919_s2 }
   0x4   :  { %23 = vsyncpa [#allocation3], 0 }
   0x5   :  { %24 = vsyncpa [#allocation6], 0 }
   0x6   :  { %25 = vsyncpa [#allocation9], 0 }
   0x7   :  { %26 = vsyncpa [#allocation12], 0 }
   0x8   :  { %27 = vsyncpa [#allocation15], 0 }
   0x9   :  { %28 = vsyncpa [#allocation18], 0 }
   0xa   :  { %29 = vsyncpa [#allocation21], 0  ;;  %s57_s29 = sshll.u32 %s1922_s5, 4  ;;  %s58_s29 = int_to_ptr.hbm [resolvable:$true] %s57_s29 }
   0xb   :  { %30 = vsyncpa [#allocation4], 0  ;;  %s1551_s30 = smov [#allocation5]   ;;  %s80_s20 = sshll.u32 %s1925_s8, 4  ;;  %s81_s20 = int_to_ptr.hbm [resolvable:$true] %s80_s20 }
   0xc   :  { %s59_s0 = sshll.u32 %s1551_s30, 4  ;;  %s1552_s21 = smov [#allocation8]   ;;  %s60_s0 = int_to_ptr.vmem [resolvable:$true] %s59_s0 }
   0xd   :  { %62 = dma.hbm_to_vmem [thread:$0]  %s58_s29, 16, %s60_s0, [#allocation6]  }
   0xe   :  { %s82_s22 = sshll.u32 %s1552_s21, 4  ;;  %s104_s24 = sshll.u32 %s1927_s10, 4  ;;  %s83_s22 = int_to_ptr.vmem [resolvable:$true] %s82_s22  ;;  %s105_s24 = int_to_ptr.hbm [resolvable:$true] %s104_s24 }
   0xf   :  { %s1553_s5 = smov 128   ;;  %s1554_s25 = smov 8  }
  0x10   :  { %88 = dma.hbm_to_vmem [thread:$0]  %s81_s20, 512, %s83_s22, [#allocation9], %s1553_s5, %s1553_s5, %s1554_s25  }
  0x11   :  { %s131_s28 = sshll.u32 %s1930_s13, 4  ;;  %s1555_s8 = smov [#allocation11]   ;;  %s132_s28 = int_to_ptr.hbm [resolvable:$true] %s131_s28 }
  0x12   :  { %s106_s29 = sshll.u32 %s1555_s8, 4  ;;  %s1556_s10 = smov [#allocation14]   ;;  %s107_s29 = int_to_ptr.vmem [resolvable:$true] %s106_s29 }
  0x13   :  { %112 = dma.hbm_to_vmem [thread:$0]  %s105_s24, 512, %s107_s29, [#allocation12], %s1553_s5, %s1553_s5, %s1554_s25  }
  0x14   :  { %s133_s30 = sshll.u32 %s1556_s10, 4  ;;  %s153_s1 = sshll.u32 %s1932_s15, 4  ;;  %s134_s30 = int_to_ptr.vmem [resolvable:$true] %s133_s30  ;;  %s154_s1 = int_to_ptr.hbm [resolvable:$true] %s153_s1 }
  0x15   :  { %136 = dma.hbm_to_vmem [thread:$0]  %s132_s28, 16, %s134_s30, [#allocation15]  }
  0x16   :  { %s1941_s13 = sld [smem:[#allocation31_spill]]  ;;  %s1557_s2 = smov [#allocation17]  }
  0x17   :  { %s155_s23 = sshll.u32 %s1557_s2, 4  ;;  %s1558_s26 = smov [#allocation2]   ;;  %s156_s23 = int_to_ptr.vmem [resolvable:$true] %s155_s23 }
  0x18   :  { %158 = dma.hbm_to_vmem [thread:$0]  %s154_s1, 16, %s156_s23, [#allocation18]  }
  0x19   :  { %s37_s24 = sshll.u32 %s1558_s26, 4  ;;  %s70_s29 = sshll.u32 %s1924_s7, 4  ;;  %s38_s24 = int_to_ptr.vmem [resolvable:$true] %s37_s24  ;;  %s71_s29 = int_to_ptr.hbm [resolvable:$true] %s70_s29 }
  0x1a   :  { %s94_s10 = sshll.u32 %s1926_s9, 4  ;;  %s1559_s30 = smov [#allocation7]   ;;  %s95_s10 = int_to_ptr.hbm [resolvable:$true] %s94_s10 }
  0x1b   :  { %s72_s0 = sshll.u32 %s1559_s30, 4  ;;  %s1560_s19 = smov [#allocation10]   ;;  %s73_s0 = int_to_ptr.vmem [resolvable:$true] %s72_s0 }
  0x1c   :  { %s35_s22 = sshll.u32 %s1941_s13, 4  ;;  %s96_s1 = sshll.u32 %s1560_s19, 4  ;;  %s36_s22 = int_to_ptr.hbm [resolvable:$true] %s35_s22  ;;  %s97_s1 = int_to_ptr.vmem [resolvable:$true] %s96_s1 }
  0x1d   :  { %43 = dma.hbm_to_vmem [thread:$0]  %s36_s22, 256, %s38_s24, [#allocation3], %s1553_s5, %s1553_s5, %s1554_s25  }
  0x1e   :  { %75 = dma.hbm_to_vmem [thread:$0]  %s71_s29, 16, %s73_s0, [#allocation6]  }
  0x1f   :  { %s118_s7 = sshll.u32 %s1928_s11, 4  ;;  %s142_s2 = sshll.u32 %s1931_s14, 4  ;;  %s119_s7 = int_to_ptr.hbm [resolvable:$true] %s118_s7  ;;  %s143_s2 = int_to_ptr.hbm [resolvable:$true] %s142_s2 }
  0x20   :  { %99 = dma.hbm_to_vmem [thread:$0]  %s95_s10, 16, %s97_s1, [#allocation9]  }
  0x21   :  { %s1561_s23 = smov [#allocation13]   ;;  %s1562_s26 = smov [#allocation16]  }
  0x22   :  { %s120_s9 = sshll.u32 %s1561_s23, 4  ;;  %s144_s24 = sshll.u32 %s1562_s26, 4  ;;  %s121_s9 = int_to_ptr.vmem [resolvable:$true] %s120_s9  ;;  %s145_s24 = int_to_ptr.vmem [resolvable:$true] %s144_s24 }
  0x23   :  { %123 = dma.hbm_to_vmem [thread:$0]  %s119_s7, 16, %s121_s9, [#allocation12]  }
  0x24   :  { %s164_s29 = sshll.u32 %s1933_s16, 4  ;;  %s175_s28 = sshll.u32 %s1934_s17, 4  ;;  %s165_s29 = int_to_ptr.hbm [resolvable:$true] %s164_s29  ;;  %s176_s28 = int_to_ptr.hbm [resolvable:$true] %s175_s28 }
  0x25   :  { %147 = dma.hbm_to_vmem [thread:$0]  %s143_s2, 16, %s145_s24, [#allocation15]  }
  0x26   :  { %s1563_s10 = smov [#allocation19]   ;;  %s1564_s30 = smov [#allocation20]  }
  0x27   :  { %s166_s14 = sshll.u32 %s1563_s10, 4  ;;  %s177_s0 = sshll.u32 %s1564_s30, 4  ;;  %s167_s14 = int_to_ptr.vmem [resolvable:$true] %s166_s14  ;;  %s178_s0 = int_to_ptr.vmem [resolvable:$true] %s177_s0 }
  0x28   :  { %169 = dma.hbm_to_vmem [thread:$0]  %s165_s29, 16, %s167_s14, [#allocation18]  }
  0x29   :  { %180 = dma.hbm_to_vmem [thread:$0]  %s176_s28, 16, %s178_s0, [#allocation21]  }
  0x2a   :  { %1535 = dma.done.wait [#allocation3], 256  }
  0x2b   :  { %1536 = vsyncadd [#allocation3], 4294967040 }
  0x2c   :  { %1537 = dma.done.wait [#allocation6], 32  }
  0x2d   :  { %1538 = vsyncadd [#allocation6], 4294967264 }
  0x2e   :  { %1539 = dma.done.wait [#allocation9], 528  }
  0x2f   :  { %1540 = vsyncadd [#allocation9], 4294966768 }
  0x30   :  { %1541 = dma.done.wait [#allocation12], 528  }
  0x31   :  { %1542 = vsyncadd [#allocation12], 4294966768 }
  0x32   :  { %1543 = dma.done.wait [#allocation15], 32  }
  0x33   :  { %1544 = vsyncadd [#allocation15], 4294967264 }
  0x34   :  { %1545 = dma.done.wait [#allocation18], 32  }
  0x35   :  { %1546 = vsyncadd [#allocation18], 4294967264 }
  0x36   :  { %1547 = dma.done.wait [#allocation21], 16  }
  0x37   :  { %1548 = vsyncadd [#allocation21], 4294967280  ;;  %s1942_s19 = sld [smem:[#allocation33_spill]]  ;;  %v1722_v4 = vld [vmem:[#allocation2 + $0x8] sm:$0xff]  ;;  %vm241_vm0 = vcmask 261120   ;;  %v274_v5 = vld [vmem:[%s1921_s4 + $0x18] sm:$0xff] }
  0x38   :  { %v1727_v6 = vld [vmem:[#allocation2] sm:$0xff]  ;;  %v273_v7 = vld [vmem:[%s1921_s4 + $0x10] sm:$0xff]  ;;  %v272_v8 = vld [vmem:[%s1921_s4 + $0x8] sm:$0xff]  ;;  %vm333_vm1 = vcmask 64512   ;;  %s1565_s11 = smov 120   ;;  %s1566_s28 = smov 112  }
  0x39   :  { %v271_v9 = vld [vmem:[%s1921_s4] sm:$0xff]  ;;  %v1172_v12 = vld [vmem:[#allocation5] ss:$0 sm:$0xff]  ;;  %s1943_s30 = sld [smem:[#allocation32_spill]]  ;;  %vm373_vm2 = vcmask 130048   ;;  %v305_v34 = vld [vmem:[%s1923_s6 + $0x18] sm:$0xff] }
  0x3a   :  { %v1171_v16 = vld [vmem:[%s1920_s3] ss:$0 sm:$0xff]  ;;  %s1567_s3 = smov 104   ;;  %v304_v35 = vld [vmem:[%s1923_s6 + $0x10] sm:$0xff]  ;;  %322 = vmatpush.msra.mxu2 %v305_v34  ;;  %v303_v36 = vld [vmem:[%s1923_s6 + $0x8] sm:$0xff]  ;;  %vm976_vm10 = vcmask 523264  }
  0x3b   :  { %v302_v37 = vld [vmem:[%s1923_s6] sm:$0xff]  ;;  %v1173_v50 = vld [vmem:[#allocation7] ss:$0 sm:$0xff]  ;;  %v425_v54 = vld [vmem:[#allocation8] sm:$0xff]  ;;  %s1072_s17 = sshll.u32 %s1935_s18, 4  ;;  %s1073_s17 = int_to_ptr.hbm [resolvable:$true] %s1072_s17 }
  0x3c   :  { %323 = vmatpush.msra.mxu2 %v304_v35 }
  0x3d   :  { %v236_v0 = vld [vmem:[%s1942_s19 + $0x18] sm:$0xff]  ;;  %v235_v1 = vld [vmem:[%s1942_s19 + $0x10] sm:$0xff]  ;;  %v234_v2 = vld [vmem:[%s1942_s19 + $0x8] sm:$0xff] }
  0x3e   :  { %1133 = vmatpush.msra.mxu1 %v236_v0  ;;  %260 = vmatpush.msra.mxu0 %v236_v0  ;;  %v233_v3 = vld [vmem:[%s1942_s19] sm:$0xff] }
  0x3f   :  { %v1771_v25 = vld [vmem:[%s1943_s30] sm:$0xff]  ;;  %v1778_v30 = vld [vmem:[%s1943_s30 + $0x8] sm:$0xff]  ;;  %324 = vmatpush.msra.mxu2 %v303_v36 }
  0x40   :  { %1134 = vmatpush.msra.mxu1 %v235_v1  ;;  %261 = vmatpush.msra.mxu0 %v235_v1 }
  0x41   :  { %325 = vmatpush.msra.mxu2 %v302_v37 }
  0x42   :  { %1135 = vmatpush.msra.mxu1 %v234_v2  ;;  %262 = vmatpush.msra.mxu0 %v234_v2 }
  0x43   :  { %1095 = vmatmul.msk.f32.vlgmr.msra.gmra.mxu2 %vm241_vm0, %v1727_v6 }
  0x44   :  { %1136 = vmatpush.msra.mxu1 %v233_v3  ;;  %263 = vmatpush.msra.mxu0 %v233_v3 }
  0x45   :  { %1092 = vmatmul.msk.f32.vlgmr.msra.gmra.mxu1 %vm241_vm0, %v1722_v4  ;;  %1091 = vmatmul.msk.f32.vlgmr.msra.gmra.mxu0 %vm241_vm0, %v1727_v6 }
  0x46   :  { %291 = vmatpush.msrb.mxu1 %v274_v5 }
  0x48   :  { %292 = vmatpush.msrb.mxu1 %v273_v7 }
  0x4a   :  { %293 = vmatpush.msrb.mxu1 %v272_v8 }
  0x4b   :  { %1096 = vmatmul.msk.f32.gmra.mxu2 %vm241_vm0, %v1722_v4 }
  0x4c   :  { %294 = vmatpush.msrb.mxu1 %v271_v9 }
  0x4d   :  { %1093 = vmatmul.msk.f32.vlgmr.msrb.gmra.mxu1 %vm241_vm0, %v1727_v6 }
  0x55   :  { %1094 = vmatmul.msk.f32.gmra.mxu1 %vm241_vm0, %v1722_v4 }
  0xc2   :  { %v268_v10 = vpop.f32.mrf.mxu1  ;;  %v265_v15 = vpop.f32.mrf.mxu0 }
  0xc3   :  { %v266_v18 = vadd.f32 %v1171_v16, %v265_v15  ;;  %v1754_v19 = vadd.f32 %v1171_v16, %v268_v10 }
  0xc6   :  { %v327_v49 = vpop.f32.mrf.mxu2 }
  0xc7   :  { %v328_v52 = vadd.f32 %v1173_v50, %v327_v49 }
  0xca   :  { %v296_v11 = vpop.f32.mrf.mxu1 }
  0xcb   :  { %v297_v17 = vadd.f32 %v1172_v12, %v296_v11 }
  0xce   :  { %v330_v51 = vpop.f32.mrf.mxu2 }
  0xcf   :  { %v331_v53 = vadd.f32 %v1173_v50, %v330_v51 }
  0xd1   :  { %416 = vmatpush.msrb.mxu0 %v331_v53  ;;  %v1808_v55 = vpack.i.bf16 %v328_v52, %v331_v53 }
  0xd2   :  { %v299_v13 = vpop.f32.mrf.mxu1 }
  0xd3   :  { %v300_v14 = vadd.f32 %v1172_v12, %v299_v13  ;;  %417 = vmatpush.msrb.mxu0 %v328_v52 }
  0xd5   :  { %432 = vrot.lane.b32.xlu2 %v300_v14, %s1565_s11  ;;  %1097 = vmatpush.xpose.msk.msra.mxu3 %vm333_vm1, %v300_v14 }
  0xd6   :  { %580 = vmatpush.msra.mxu0 %v425_v54 }
  0xd9   :  { %1098 = vmatpush.xpose.msk.msra.mxu3 %vm333_vm1, %v297_v17 }
  0xdc   :  { %1099 = vmatmul.msk.f32.vlgmr.msra.gmra.mxu3 %vm333_vm1, %v266_v18 }
  0xdd   :  { %430 = vrot.lane.b32.xlu2 %v297_v17, %s1565_s11 }
  0xe4   :  { %1100 = vmatmul.msk.f32.gmra.mxu3 %vm333_vm1, %v1754_v19 }
  0xe5   :  { %594 = vrot.lane.b32.xlu2 %v300_v14, %s1566_s28 }
  0xed   :  { %592 = vrot.lane.b32.xlu2 %v297_v17, %s1566_s28 }
  0xf5   :  { %588 = vrot.lane.b32.xlu2 %v266_v18, %s1566_s28 }
  0xfd   :  { %725 = vrot.lane.b32.xlu2 %v297_v17, %s1567_s3 }
 0x105   :  { %723 = vrot.lane.b32.xlu2 %v1754_v19, %s1567_s3 }
 0x12f   :  { %v433_v20 = vpop.permute.xlu2 %432 }
 0x130   :  { %1103 = vmatpush.xpose.msk.msra.mxu1 %vm333_vm1, %v433_v20 }
 0x137   :  { %v431_v21 = vpop.permute.xlu2 %430 }
 0x138   :  { %1104 = vmatpush.xpose.msk.msra.mxu1 %vm333_vm1, %v431_v21 }
 0x13f   :  { %v595_v22 = vpop.permute.xlu2 %594 }
 0x140   :  { %1113 = vmatpush.xpose.msk.msrb.mxu1 %vm333_vm1, %v595_v22 }
 0x147   :  { %v593_v23 = vpop.permute.xlu2 %592 }
 0x148   :  { %1114 = vmatpush.xpose.msk.msrb.mxu1 %vm333_vm1, %v593_v23 }
 0x14f   :  { %v589_v57 = vpop.permute.xlu2 %588 }
 0x157   :  { %v726_v62 = vpop.permute.xlu2 %725 }
 0x15f   :  { %v363_v24 = vpop.f32.mrf.mxu3  ;;  %v724_v13 = vpop.permute.xlu2 %723 }
 0x160   :  { %v369_v26 = vmul.f32 0.35355338, %v363_v24 }
 0x162   :  { %v371_v27 = vadd.f32 %v369_v26, %v1771_v25 }
 0x164   :  { %v374_v28 = vsel %vm373_vm2, %v371_v27, -inf }
 0x165   :  { %375 = vmax.xlane.f32.xlu0 %v374_v28 }
 0x167   :  { %v366_v29 = vpop.f32.mrf.mxu3 }
 0x168   :  { %v370_v31 = vmul.f32 0.35355338, %v366_v29 }
 0x16a   :  { %v372_v32 = vadd.f32 %v370_v31, %v1778_v30 }
 0x16c   :  { %v377_v33 = vsel %vm373_vm2, %v372_v32, -inf }
 0x16d   :  { %378 = vmax.xlane.f32.xlu0 %v377_v33 }
 0x181   :  { %426 = vrot.lane.b32.xlu0 %v266_v18, %s1565_s11 }
 0x189   :  { %727 = vrot.lane.b32.xlu0 %v300_v14, %s1567_s3 }
 0x191   :  { %721 = vrot.lane.b32.xlu0 %v266_v18, %s1567_s3 }
 0x1d8   :  { %v376_v38 = vpop.xlane.xlu0 %375 }
 0x1d9   :  { %v380_v39 = vsub.f32 %v371_v27, %v376_v38 }
 0x1db   :  { %v382_v40 = vmul.f32 1.442695, %v380_v39 }
 0x1dd   :  { %1181 = vpow2.f32 %v382_v40 }
 0x1e0   :  { %v379_v41 = vpop.xlane.xlu0 %378 }
 0x1e1   :  { %v381_v42 = vsub.f32 %v372_v32, %v379_v41 }
 0x1e3   :  { %v1182_v43 = vpop.eup %1181  ;;  %v384_v44 = vmul.f32 1.442695, %v381_v42 }
 0x1e4   :  { %v386_v45 = vsel %vm373_vm2, %v1182_v43, 0.0 }
 0x1e5   :  { %1183 = vpow2.f32 %v384_v44  ;;  %387 = vadd.xlane.f32.xlu1 %v386_v45 }
 0x1eb   :  { %v1184_v46 = vpop.eup %1183 }
 0x1ec   :  { %v389_v47 = vsel %vm373_vm2, %v1184_v46, 0.0 }
 0x1ed   :  { %390 = vadd.xlane.f32.xlu1 %v389_v47 }
 0x1f3   :  { %v427_v48 = vpop.permute.xlu0 %426 }
 0x1f4   :  { %1105 = vmatmul.msk.f32.vlgmr.msra.gmra.mxu1 %vm333_vm1, %v427_v48 }
 0x1fb   :  { %v728_v61 = vpop.permute.xlu0 %727 }
 0x203   :  { %v722_v11 = vpop.permute.xlu0 %721 }
 0x206   :  { %428 = vrot.lane.b32.xlu1 %v1754_v19, %s1565_s11 }
 0x20e   :  { %590 = vrot.lane.b32.xlu1 %v1754_v19, %s1566_s28 }
 0x258   :  { %v388_v56 = vpop.xlane.xlu1 %387 }
 0x259   :  { %1185 = vrcp.f32 %v388_v56 }
 0x25f   :  { %v1186_v58 = vpop.eup %1185 }
 0x260   :  { %v391_v59 = vpop.xlane.xlu1 %390  ;;  %v394_v60 = vmul.f32 %v1186_v58, %v1182_v43 }
 0x261   :  { %1187 = vrcp.f32 %v391_v59 }
 0x262   :  { %1101 = vmatmul.msk.f32.vlgmr.msrb.gmra.mxu0 %vm373_vm2, %v394_v60 }
 0x263   :  { %1121 = vmatpush.xpose.msk.msrb.mxu0 %vm333_vm1, %v728_v61 }
 0x267   :  { %v1188_v63 = vpop.eup %1187  ;;  %1122 = vmatpush.xpose.msk.msrb.mxu0 %vm333_vm1, %v726_v62 }
 0x268   :  { %v395_v0 = vmul.f32 %v1188_v63, %v1184_v46 }
 0x26a   :  { %1102 = vmatmul.msk.f32.gmra.mxu0 %vm373_vm2, %v395_v0 }
 0x271   :  { %v459_v1 = vpop.f32.mrf.mxu1 }
 0x272   :  { %v465_v2 = vmul.f32 0.35355338, %v459_v1 }
 0x274   :  { %v467_v3 = vadd.f32 %v465_v2, %v1771_v25 }
 0x276   :  { %v469_v5 = vsel %vm373_vm2, %v467_v3, -inf }
 0x277   :  { %470 = vmax.xlane.f32.xlu1 %v469_v5 }
 0x278   :  { %v429_v7 = vpop.permute.xlu1 %428 }
 0x279   :  { %1106 = vmatmul.msk.f32.gmra.mxu1 %vm333_vm1, %v429_v7 }
 0x280   :  { %v591_v8 = vpop.permute.xlu1 %590 }
 0x281   :  { %1115 = vmatmul.msk.f32.vlgmr.msrb.gmra.mxu1 %vm333_vm1, %v589_v57 }
 0x289   :  { %1116 = vmatmul.msk.f32.gmra.mxu1 %vm333_vm1, %v591_v8 }
 0x2df   :  { %v419_v9 = vpop.f32.mrf.mxu0 }
 0x2e0   :  { %1111 = vmatmul.msk.f32.vlgmr.msra.gmra.mxu0 %vm333_vm1, %v419_v9 }
 0x2e7   :  { %v422_v10 = vpop.f32.mrf.mxu0 }
 0x2e8   :  { %1112 = vmatmul.msk.f32.gmra.mxu0 %vm333_vm1, %v422_v10 }
 0x2ea   :  { %v471_v18 = vpop.xlane.xlu1 %470 }
 0x2eb   :  { %v475_v21 = vsub.f32 %v467_v3, %v471_v18 }
 0x2ed   :  { %v477_v23 = vmul.f32 1.442695, %v475_v21 }
 0x2ef   :  { %1189 = vpow2.f32 %v477_v23 }
 0x2f0   :  { %1123 = vmatmul.msk.f32.vlgmr.msrb.gmra.mxu0 %vm333_vm1, %v722_v11 }
 0x2f5   :  { %v1190_v29 = vpop.eup %1189 }
 0x2f6   :  { %v462_v12 = vpop.f32.mrf.mxu1  ;;  %v481_v31 = vsel %vm373_vm2, %v1190_v29, 0.0 }
 0x2f7   :  { %v466_v14 = vmul.f32 0.35355338, %v462_v12 }
 0x2f8   :  { %1124 = vmatmul.msk.f32.gmra.mxu0 %vm333_vm1, %v724_v13 }
 0x2f9   :  { %v468_v15 = vadd.f32 %v466_v14, %v1778_v30 }
 0x2fb   :  { %v472_v16 = vsel %vm373_vm2, %v468_v15, -inf }
 0x2fc   :  { %473 = vmax.xlane.f32.xlu0 %v472_v16 }
 0x2fe   :  { %v621_v17 = vpop.f32.mrf.mxu1 }
 0x2ff   :  { %v627_v19 = vmul.f32 0.35355338, %v621_v17 }
 0x301   :  { %v629_v20 = vadd.f32 %v627_v19, %v1771_v25 }
 0x303   :  { %v631_v22 = vsel %vm373_vm2, %v629_v20, -inf }
 0x304   :  { %632 = vmax.xlane.f32.xlu2 %v631_v22 }
 0x306   :  { %v624_v24 = vpop.f32.mrf.mxu1 }
 0x307   :  { %v628_v26 = vmul.f32 0.35355338, %v624_v24  ;;  %v529_v24 = vld [vmem:[#allocation8 + $0x8] sm:$0xff] }
 0x308   :  { %551 = vmatpush.msrb.mxu3 %v529_v24  ;;  %v969_v24 = vld [vmem:[%s1929_s12 + $0x28] sm:$0xff] }
 0x309   :  { %v630_v27 = vadd.f32 %v628_v26, %v1778_v30 }
 0x30b   :  { %v634_v28 = vsel %vm373_vm2, %v630_v27, -inf }
 0x30c   :  { %635 = vmax.xlane.f32.xlu1 %v634_v28 }
 0x314   :  { %482 = vadd.xlane.f32.xlu1 %v481_v31 }
 0x35d   :  { %v1830_v32 = vpop.f32.mrf.mxu0 }
 0x365   :  { %v1832_v33 = vpop.f32.mrf.mxu0 }
 0x36d   :  { %v754_v34 = vpop.f32.mrf.mxu0 }
 0x36e   :  { %v760_v35 = vmul.f32 0.35355338, %v754_v34  ;;  %v822_v34 = vld [vmem:[#allocation8 + $0x18] sm:$0xff] }
 0x36f   :  { %v474_v36 = vpop.xlane.xlu0 %473 }
 0x370   :  { %v476_v37 = vsub.f32 %v468_v15, %v474_v36  ;;  %v762_v38 = vadd.f32 %v760_v35, %v1771_v25 }
 0x372   :  { %v479_v39 = vmul.f32 1.442695, %v476_v37  ;;  %v764_v40 = vsel %vm373_vm2, %v762_v38, -inf }
 0x373   :  { %765 = vmax.xlane.f32.xlu0 %v764_v40 }
 0x374   :  { %1191 = vpow2.f32 %v479_v39 }
 0x375   :  { %v757_v42 = vpop.f32.mrf.mxu0 }
 0x376   :  { %v761_v46 = vmul.f32 0.35355338, %v757_v42 }
 0x377   :  { %v633_v41 = vpop.xlane.xlu2 %632 }
 0x378   :  { %v637_v43 = vsub.f32 %v629_v20, %v633_v41  ;;  %v763_v49 = vadd.f32 %v761_v46, %v1778_v30 }
 0x37a   :  { %v1192_v44 = vpop.eup %1191  ;;  %v639_v45 = vmul.f32 1.442695, %v637_v43  ;;  %v767_v53 = vsel %vm373_vm2, %v763_v49, -inf }
 0x37b   :  { %v484_v47 = vsel %vm373_vm2, %v1192_v44, 0.0 }
 0x37c   :  { %1193 = vpow2.f32 %v639_v45  ;;  %485 = vadd.xlane.f32.xlu2 %v484_v47 }
 0x37f   :  { %v636_v48 = vpop.xlane.xlu1 %635 }
 0x380   :  { %v638_v50 = vsub.f32 %v630_v27, %v636_v48  ;;  %v1174_v48 = vld [vmem:[#allocation10] ss:$0 sm:$0xff] }
 0x382   :  { %v1194_v25 = vpop.eup %1193  ;;  %v641_v51 = vmul.f32 1.442695, %v638_v50 }
 0x383   :  { %v643_v52 = vsel %vm373_vm2, %v1194_v25, 0.0 }
 0x384   :  { %1195 = vpow2.f32 %v641_v51  ;;  %644 = vadd.xlane.f32.xlu1 %v643_v52  ;;  %768 = vmax.xlane.f32.xlu2 %v767_v53 }
 0x387   :  { %1157 = vrot.lane.b32.xlu0 %v1808_v55, %s1565_s11  ;;  %v483_v61 = vpop.xlane.xlu1 %482 }
 0x38a   :  { %v1196_v54 = vpop.eup %1195 }
 0x38b   :  { %v646_v56 = vsel %vm373_vm2, %v1196_v54, 0.0 }
 0x38c   :  { %647 = vadd.xlane.f32.xlu1 %v646_v56 }
 0x39c   :  { %1162 = vrot.lane.b32.xlu2 %v1808_v55, %s1566_s28 }
 0x3a5   :  { %1167 = vrot.lane.b32.xlu1 %v1808_v55, %s1567_s3 }
 0x3e6   :  { %v766_v30 = vpop.xlane.xlu0 %765 }
 0x3e7   :  { %v770_v57 = vsub.f32 %v762_v38, %v766_v30 }
 0x3e9   :  { %v772_v58 = vmul.f32 1.442695, %v770_v57 }
 0x3eb   :  { %1197 = vpow2.f32 %v772_v58 }
 0x3ec   :  { %1199 = vrcp.f32 %v483_v61 }
 0x3ef   :  { %v486_v59 = vpop.xlane.xlu2 %485 }
 0x3f0   :  { %1201 = vrcp.f32 %v486_v59 }
 0x3f1   :  { %v1198_v60 = vpop.eup %1197 }
 0x3f2   :  { %v776_v62 = vsel %vm373_vm2, %v1198_v60, 0.0  ;;  %v1200_v2 = vpop.eup %1199 }
 0x3f3   :  { %777 = vadd.xlane.f32.xlu0 %v776_v62  ;;  %v489_v7 = vmul.f32 %v1200_v2, %v1190_v29  ;;  %v689_v29 = vld [vmem:[#allocation8 + $0x10] sm:$0xff] }
 0x3f4   :  { %711 = vmatpush.msra.mxu3 %v689_v29  ;;  %v968_v29 = vld [vmem:[%s1929_s12 + $0x20] sm:$0xff] }
 0x3f6   :  { %v1202_v11 = vpop.eup %1201 }
 0x3f7   :  { %v769_v63 = vpop.xlane.xlu2 %768  ;;  %v645_v8 = vpop.xlane.xlu1 %644  ;;  %v490_v15 = vmul.f32 %v1202_v11, %v1192_v44  ;;  %v928_v11 = vld [vmem:[#allocation11 + $0x18] sm:$0xff] }
 0x3f8   :  { %v771_v0 = vsub.f32 %v763_v49, %v769_v63 }
 0x3f9   :  { %v1158_v1 = vpop.permute.xlu0 %1157 }
 0x3fa   :  { %v774_v3 = vmul.f32 1.442695, %v771_v0  ;;  %v1159_v5 = vunpack.i.l.bf16 %v1158_v1  ;;  %v1160_v55 = vunpack.i.h.bf16 %v1158_v1 }
 0x3fc   :  { %1203 = vpow2.f32 %v774_v3  ;;  %519 = vmatpush.msrb.mxu2 %v1159_v5 }
 0x3fd   :  { %1205 = vrcp.f32 %v645_v8 }
 0x3fe   :  { %520 = vmatpush.msrb.mxu2 %v1160_v55 }
 0x3ff   :  { %v1163_v9 = vpop.permute.xlu2 %1162  ;;  %1107 = vmatmul.msk.f32.vlgmr.msrb.gmra.mxu2 %vm373_vm2, %v489_v7  ;;  %v648_v16 = vpop.xlane.xlu1 %647 }
 0x400   :  { %v1164_v10 = vunpack.i.l.bf16 %v1163_v9  ;;  %v1165_v13 = vunpack.i.h.bf16 %v1163_v9  ;;  %1207 = vrcp.f32 %v648_v16 }
 0x402   :  { %v1204_v12 = vpop.eup %1203  ;;  %679 = vmatpush.msra.mxu2 %v1164_v10 }
 0x403   :  { %v779_v14 = vsel %vm373_vm2, %v1204_v12, 0.0  ;;  %v1206_v17 = vpop.eup %1205 }
 0x404   :  { %780 = vadd.xlane.f32.xlu2 %v779_v14  ;;  %680 = vmatpush.msra.mxu2 %v1165_v13  ;;  %v651_v18 = vmul.f32 %v1206_v17, %v1194_v25  ;;  %v926_v13 = vld [vmem:[#allocation11 + $0x8] sm:$0xff]  ;;  %v925_v14 = vld [vmem:[#allocation11] sm:$0xff] }
 0x406   :  { %v1208_v19 = vpop.eup %1207  ;;  %844 = vmatpush.msrb.mxu2 %v822_v34 }
 0x407   :  { %1108 = vmatmul.msk.f32.gmra.mxu2 %vm373_vm2, %v490_v15  ;;  %v652_v20 = vmul.f32 %v1208_v19, %v1196_v54 }
 0x40f   :  { %1117 = vmatmul.msk.f32.vlgmr.msra.gmra.mxu2 %vm373_vm2, %v651_v18 }
 0x417   :  { %v1168_v21 = vpop.permute.xlu1 %1167  ;;  %1118 = vmatmul.msk.f32.gmra.mxu2 %vm373_vm2, %v652_v20 }
 0x418   :  { %v1169_v22 = vunpack.i.l.bf16 %v1168_v21  ;;  %v1170_v23 = vunpack.i.h.bf16 %v1168_v21  ;;  %v971_v21 = vld [vmem:[%s1929_s12 + $0x38] sm:$0xff] }
 0x419   :  { %991 = vmatpush.msra.mxu0 %v971_v21 }
 0x41a   :  { %812 = vmatpush.msra.mxu1 %v1169_v22  ;;  %v970_v22 = vld [vmem:[%s1929_s12 + $0x30] sm:$0xff] }
 0x41b   :  { %992 = vmatpush.msra.mxu0 %v970_v22 }
 0x41c   :  { %813 = vmatpush.msra.mxu1 %v1170_v23 }
 0x41d   :  { %993 = vmatpush.msra.mxu0 %v969_v24 }
 0x41f   :  { %994 = vmatpush.msra.mxu0 %v968_v29 }
 0x466   :  { %v778_v26 = vpop.xlane.xlu0 %777 }
 0x467   :  { %1209 = vrcp.f32 %v778_v26 }
 0x46d   :  { %v1210_v27 = vpop.eup %1209 }
 0x46e   :  { %v784_v28 = vmul.f32 %v1210_v27, %v1198_v60  ;;  %v1568_v60 = vmov 32.0  }
 0x470   :  { %1125 = vmatmul.msk.f32.vlgmr.msra.gmra.mxu1 %vm373_vm2, %v784_v28 }
 0x477   :  { %v781_v31 = vpop.xlane.xlu2 %780 }
 0x478   :  { %1211 = vrcp.f32 %v781_v31 }
 0x479   :  { %1213 = vrcp.f32 %v1568_v60  ;;  %v1178_v60 = vld [vmem:[#allocation14] ss:$0 sm:$0xff] }
 0x47e   :  { %v1212_v35 = vpop.eup %1211 }
 0x47f   :  { %v785_v36 = vmul.f32 %v1212_v35, %v1204_v12  ;;  %v1214_v61 = vpop.eup %1213  ;;  %v927_v12 = vld [vmem:[#allocation11 + $0x10] sm:$0xff]  ;;  %v967_v35 = vld [vmem:[%s1929_s12 + $0x18] sm:$0xff] }
 0x480   :  { %v869_v62 = vmul.f32 32.0, %v1214_v61  ;;  %vm873_vm3 = vweird.f32 %v1214_v61  ;;  %995 = vmatpush.msra.mxu0 %v967_v35 }
 0x481   :  { %1126 = vmatmul.msk.f32.gmra.mxu1 %vm373_vm2, %v785_v36  ;;  %v1175_v36 = vld [vmem:[#allocation16] ss:$0 sm:$0xff] }
 0x482   :  { %v522_v37 = vpop.f32.mrf.mxu2 }
 0x483   :  { %1109 = vmatmul.msk.f32.vlgmr.msrb.gmra.mxu3 %vm333_vm1, %v522_v37 }
 0x484   :  { %951 = vmatpush.msrb.mxu3 %v928_v11 }
 0x486   :  { %952 = vmatpush.msrb.mxu3 %v927_v12 }
 0x488   :  { %953 = vmatpush.msrb.mxu3 %v926_v13 }
 0x48a   :  { %v525_v38 = vpop.f32.mrf.mxu2  ;;  %954 = vmatpush.msrb.mxu3 %v925_v14 }
 0x48b   :  { %1110 = vmatmul.msk.f32.gmra.mxu3 %vm333_vm1, %v525_v38 }
 0x492   :  { %v682_v39 = vpop.f32.mrf.mxu2 }
 0x493   :  { %1119 = vmatmul.msk.f32.vlgmr.msra.gmra.mxu3 %vm333_vm1, %v682_v39  ;;  %v1176_v39 = vld [vmem:[#allocation17] ss:$0 sm:$0xff] }
 0x49a   :  { %v685_v40 = vpop.f32.mrf.mxu2 }
 0x49b   :  { %1120 = vmatmul.msk.f32.gmra.mxu3 %vm333_vm1, %v685_v40 }
 0x4ed   :  { %v815_v41 = vpop.f32.mrf.mxu1 }
 0x4ee   :  { %1127 = vmatmul.msk.f32.vlgmr.msrb.gmra.mxu2 %vm333_vm1, %v815_v41 }
 0x4fe   :  { %v818_v42 = vpop.f32.mrf.mxu1 }
 0x4ff   :  { %1128 = vmatmul.msk.f32.gmra.mxu2 %vm333_vm1, %v818_v42 }
 0x506   :  { %v553_v43 = vpop.f32.mrf.mxu3 }
 0x507   :  { %v583_v46 = vadd.f32 %v1830_v32, %v553_v43 }
 0x50e   :  { %v556_v44 = vpop.f32.mrf.mxu3 }
 0x50f   :  { %v586_v54 = vadd.f32 %v1832_v33, %v556_v44 }
 0x516   :  { %v713_v45 = vpop.f32.mrf.mxu3 }
 0x517   :  { %v719_v47 = vadd.f32 %v713_v45, %v583_v46 }
 0x51e   :  { %v716_v53 = vpop.f32.mrf.mxu3 }
 0x51f   :  { %v720_v56 = vadd.f32 %v716_v53, %v586_v54  ;;  %v964_v53 = vld [vmem:[%s1929_s12] sm:$0xff]  ;;  %v1177_v54 = vld [vmem:[#allocation13] ss:$0 sm:$0xff] }
 0x571   :  { %v846_v49 = vpop.f32.mrf.mxu2 }
 0x572   :  { %v852_v50 = vadd.f32 %v846_v49, %v719_v47 }
 0x574   :  { %v858_v25 = vadd.f32 %v1174_v48, %v852_v50 }
 0x576   :  { %v860_v51 = vadd.f32 %v858_v25, %v1727_v6  ;;  %v870_v6 = vsub.f32 1.0, %v869_v62 }
 0x578   :  { %v862_v52 = vsel %vm241_vm0, %v860_v51, 0.0  ;;  %v871_v63 = vmul.f32 %v1214_v61, %v870_v6 }
 0x579   :  { %863 = vadd.xlane.f32.xlu1 %v862_v52  ;;  %v965_v52 = vld [vmem:[%s1929_s12 + $0x8] sm:$0xff] }
 0x57a   :  { %v872_v0 = vadd.f32 %v1214_v61, %v871_v63 }
 0x57c   :  { %v1867_v1 = vsel %vm873_vm3, %v1214_v61, %v872_v0 }
 0x582   :  { %v849_v30 = vpop.f32.mrf.mxu2 }
 0x583   :  { %v853_v57 = vadd.f32 %v849_v30, %v720_v56 }
 0x585   :  { %v859_v58 = vadd.f32 %v1174_v48, %v853_v57 }
 0x587   :  { %v861_v59 = vadd.f32 %v859_v58, %v1722_v4 }
 0x589   :  { %v865_v32 = vsel %vm241_vm0, %v861_v59, 0.0 }
 0x58a   :  { %866 = vadd.xlane.f32.xlu0 %v865_v32 }
 0x5ec   :  { %v864_v33 = vpop.xlane.xlu1 %863 }
 0x5ed   :  { %v875_v2 = vmul.f32 %v1867_v1, %v864_v33 }
 0x5ef   :  { %v877_v3 = vsub.f32 %v860_v51, %v875_v2  ;;  %v966_v51 = vld [vmem:[%s1929_s12 + $0x10] sm:$0xff]  ;;  %s1569_s12 = smov [#allocation22]  }
 0x5f0   :  { %996 = vmatpush.msra.mxu0 %v966_v51  ;;  %s1070_s30 = sshll.u32 %s1569_s12, 4  ;;  %s1071_s30 = int_to_ptr.vmem [resolvable:$true] %s1070_s30 }
 0x5f1   :  { %v879_v5 = vmul.f32 %v877_v3, %v877_v3 }
 0x5f2   :  { %997 = vmatpush.msra.mxu0 %v965_v52 }
 0x5f3   :  { %v881_v4 = vsel %vm241_vm0, %v879_v5, 0.0 }
 0x5f4   :  { %882 = vadd.xlane.f32.xlu0 %v881_v4  ;;  %998 = vmatpush.msra.mxu0 %v964_v53 }
 0x5fd   :  { %v867_v55 = vpop.xlane.xlu0 %866 }
 0x5fe   :  { %v876_v7 = vmul.f32 %v1867_v1, %v867_v55 }
 0x600   :  { %v878_v8 = vsub.f32 %v861_v59, %v876_v7 }
 0x602   :  { %v880_v9 = vmul.f32 %v878_v8, %v878_v8 }
 0x604   :  { %v884_v10 = vsel %vm241_vm0, %v880_v9, 0.0 }
 0x605   :  { %885 = vadd.xlane.f32.xlu2 %v884_v10 }
 0x667   :  { %v883_v15 = vpop.xlane.xlu0 %882 }
 0x668   :  { %v887_v16 = vmul.f32 %v883_v15, %v1867_v1 }
 0x66a   :  { %v889_v17 = vadd.f32 1e-05, %v887_v16 }
 0x66c   :  { %1215 = vrsqrt.f32 %v889_v17  ;;  %vm897_vm5 = vweird.f32 %v889_v17 }
 0x672   :  { %v1216_v18 = vpop.eup %1215 }
 0x673   :  { %v892_v19 = vmul.f32 %v1216_v18, %v889_v17  ;;  %vm898_vm4 = vweird.f32 %v1216_v18 }
 0x674   :  { %vm899_vm6 = vmor %vm897_vm5, %vm898_vm4 }
 0x675   :  { %v893_v20 = vmul.f32 %v1216_v18, %v892_v19 }
 0x677   :  { %v894_v23 = vmul.f32 0.5, %v893_v20 }
 0x678   :  { %v886_v26 = vpop.xlane.xlu2 %885 }
 0x679   :  { %v895_v27 = vsub.f32 1.5, %v894_v23  ;;  %v888_v28 = vmul.f32 %v886_v26, %v1867_v1 }
 0x67b   :  { %v896_v31 = vmul.f32 %v1216_v18, %v895_v27  ;;  %v890_v34 = vadd.f32 1e-05, %v888_v28  ;;  %v1179_v27 = vld [vmem:[#allocation19] ss:$0 sm:$0xff] }
 0x67d   :  { %v900_v37 = vsel %vm899_vm6, %v1216_v18, %v896_v31  ;;  %1217 = vrsqrt.f32 %v890_v34  ;;  %vm907_vm8 = vweird.f32 %v890_v34  ;;  %v1180_v31 = vld [vmem:[#allocation20] ss:$0 sm:$0xff] }
 0x67e   :  { %v911_v38 = vmul.f32 %v900_v37, %v877_v3 }
 0x680   :  { %v917_v40 = vmul.f32 %v1175_v36, %v911_v38 }
 0x682   :  { %v923_v41 = vadd.f32 %v1176_v39, %v917_v40 }
 0x683   :  { %v1218_v42 = vpop.eup %1217 }
 0x684   :  { %v902_v43 = vmul.f32 %v1218_v42, %v890_v34  ;;  %1129 = vmatmul.msk.f32.vlgmr.msrb.gmra.mxu3 %vm241_vm0, %v923_v41  ;;  %vm908_vm7 = vweird.f32 %v1218_v42 }
 0x685   :  { %vm909_vm9 = vmor %vm907_vm8, %vm908_vm7 }
 0x686   :  { %v903_v44 = vmul.f32 %v1218_v42, %v902_v43 }
 0x688   :  { %v904_v45 = vmul.f32 0.5, %v903_v44 }
 0x68a   :  { %v905_v46 = vsub.f32 1.5, %v904_v45 }
 0x68c   :  { %v906_v47 = vmul.f32 %v1218_v42, %v905_v46 }
 0x68e   :  { %v910_v48 = vsel %vm909_vm9, %v1218_v42, %v906_v47 }
 0x68f   :  { %v912_v49 = vmul.f32 %v910_v48, %v878_v8 }
 0x691   :  { %v918_v50 = vmul.f32 %v1175_v36, %v912_v49 }
 0x693   :  { %v924_v25 = vadd.f32 %v1176_v39, %v918_v50 }
 0x695   :  { %1130 = vmatmul.msk.f32.gmra.mxu3 %vm241_vm0, %v924_v25 }
 0x707   :  { %v956_v56 = vpop.f32.mrf.mxu3 }
 0x708   :  { %v957_v30 = vadd.f32 %v1177_v54, %v956_v56 }
 0x70a   :  { %v962_v57 = vmax.f32 %v957_v30, 0.0 }
 0x70c   :  { %1131 = vmatmul.msk.f32.vlgmr.msra.gmra.mxu0 %vm976_vm10, %v962_v57 }
 0x718   :  { %v959_v58 = vpop.f32.mrf.mxu3 }
 0x719   :  { %v960_v59 = vadd.f32 %v1177_v54, %v959_v58 }
 0x71b   :  { %v963_v32 = vmax.f32 %v960_v59, 0.0 }
 0x71d   :  { %1132 = vmatmul.msk.f32.gmra.mxu0 %vm976_vm10, %v963_v32 }
 0x789   :  { %v1000_v61 = vpop.f32.mrf.mxu0 }
 0x78a   :  { %v1001_v62 = vadd.f32 %v1178_v60, %v1000_v61 }
 0x78c   :  { %v1006_v6 = vadd.f32 %v1001_v62, %v923_v41 }
 0x78e   :  { %v1008_v63 = vsel %vm241_vm0, %v1006_v6, 0.0 }
 0x78f   :  { %1009 = vadd.xlane.f32.xlu0 %v1008_v63 }
 0x79a   :  { %v1003_v0 = vpop.f32.mrf.mxu0 }
 0x79b   :  { %v1004_v33 = vadd.f32 %v1178_v60, %v1003_v0 }
 0x79d   :  { %v1007_v2 = vadd.f32 %v1004_v33, %v924_v25 }
 0x79f   :  { %v1011_v3 = vsel %vm241_vm0, %v1007_v2, 0.0 }
 0x7a0   :  { %1012 = vadd.xlane.f32.xlu2 %v1011_v3 }
 0x802   :  { %v1010_v5 = vpop.xlane.xlu0 %1009 }
 0x803   :  { %v1014_v4 = vmul.f32 %v1010_v5, %v1867_v1 }
 0x805   :  { %v1016_v55 = vsub.f32 %v1006_v6, %v1014_v4 }
 0x807   :  { %v1018_v7 = vmul.f32 %v1016_v55, %v1016_v55 }
 0x809   :  { %v1020_v8 = vsel %vm241_vm0, %v1018_v7, 0.0 }
 0x80a   :  { %1021 = vadd.xlane.f32.xlu0 %v1020_v8 }
 0x813   :  { %v1013_v9 = vpop.xlane.xlu2 %1012 }
 0x814   :  { %v1015_v10 = vmul.f32 %v1013_v9, %v1867_v1 }
 0x816   :  { %v1017_v11 = vsub.f32 %v1007_v2, %v1015_v10 }
 0x818   :  { %v1019_v12 = vmul.f32 %v1017_v11, %v1017_v11 }
 0x81a   :  { %v1023_v13 = vsel %vm241_vm0, %v1019_v12, 0.0 }
 0x81b   :  { %1024 = vadd.xlane.f32.xlu1 %v1023_v13 }
 0x87d   :  { %v1022_v14 = vpop.xlane.xlu0 %1021 }
 0x87e   :  { %v1026_v15 = vmul.f32 %v1022_v14, %v1867_v1 }
 0x880   :  { %v1028_v16 = vadd.f32 1e-05, %v1026_v15 }
 0x882   :  { %1219 = vrsqrt.f32 %v1028_v16  ;;  %vm1036_vm12 = vweird.f32 %v1028_v16 }
 0x888   :  { %v1220_v17 = vpop.eup %1219 }
 0x889   :  { %v1031_v18 = vmul.f32 %v1220_v17, %v1028_v16  ;;  %vm1037_vm11 = vweird.f32 %v1220_v17 }
 0x88a   :  { %vm1038_vm13 = vmor %vm1036_vm12, %vm1037_vm11 }
 0x88b   :  { %v1032_v19 = vmul.f32 %v1220_v17, %v1031_v18 }
 0x88d   :  { %v1033_v20 = vmul.f32 0.5, %v1032_v19 }
 0x88e   :  { %v1025_v21 = vpop.xlane.xlu1 %1024 }
 0x88f   :  { %v1034_v22 = vsub.f32 1.5, %v1033_v20  ;;  %v1027_v23 = vmul.f32 %v1025_v21, %v1867_v1 }
 0x891   :  { %v1035_v24 = vmul.f32 %v1220_v17, %v1034_v22  ;;  %v1029_v26 = vadd.f32 1e-05, %v1027_v23 }
 0x893   :  { %v1039_v28 = vsel %vm1038_vm13, %v1220_v17, %v1035_v24  ;;  %1221 = vrsqrt.f32 %v1029_v26  ;;  %vm1046_vm15 = vweird.f32 %v1029_v26 }
 0x894   :  { %v1050_v29 = vmul.f32 %v1039_v28, %v1016_v55 }
 0x896   :  { %v1056_v34 = vmul.f32 %v1179_v27, %v1050_v29 }
 0x898   :  { %v1062_v35 = vadd.f32 %v1180_v31, %v1056_v34 }
 0x899   :  { %v1222_v36 = vpop.eup %1221 }
 0x89a   :  { %v1041_v37 = vmul.f32 %v1222_v36, %v1029_v26  ;;  %1064 = vst.msk [vmem:[#allocation22] sm:$0xff] %vm241_vm0, %v1062_v35  ;;  %vm1047_vm14 = vweird.f32 %v1222_v36 }
 0x89b   :  { %vm1048_vm1 = vmor %vm1046_vm15, %vm1047_vm14 }
 0x89c   :  { %v1042_v38 = vmul.f32 %v1222_v36, %v1041_v37 }
 0x89e   :  { %v1043_v39 = vmul.f32 0.5, %v1042_v38 }
 0x8a0   :  { %v1044_v40 = vsub.f32 1.5, %v1043_v39 }
 0x8a2   :  { %v1045_v1 = vmul.f32 %v1222_v36, %v1044_v40 }
 0x8a4   :  { %v1049_v41 = vsel %vm1048_vm1, %v1222_v36, %v1045_v1 }
 0x8a5   :  { %v1051_v42 = vmul.f32 %v1049_v41, %v1017_v11 }
 0x8a7   :  { %v1057_v43 = vmul.f32 %v1179_v27, %v1051_v42 }
 0x8a9   :  { %v1063_v44 = vadd.f32 %v1180_v31, %v1057_v43 }
 0x8ab   :  { %1065 = vst.msk [vmem:[#allocation22 + $0x8] sm:$0xff] %vm241_vm0, %v1063_v44 }
 0x8ac   :  { %1078 = dma.vmem_to_hbm [thread:$0]  %s1071_s30, 256, %s1073_s17, [#allocation4], %s1553_s5, %s1553_s5, %s1554_s25  }
 0x8ad   :  { %1549 = dma.done.wait [#allocation4], 256  }
 0x8ae   :  { %1550 = vsyncadd [#allocation4], 4294967040 }
 0x8af   :  { %1083 = vsyncpa [#allocation3], 1 }
 0x8b0   :  { %1084 = vsyncpa [#allocation6], 1 }
 0x8b1   :  { %1085 = vsyncpa [#allocation9], 1 }
 0x8b2   :  { %1086 = vsyncpa [#allocation12], 1 }
 0x8b3   :  { %1087 = vsyncpa [#allocation15], 1 }
 0x8b4   :  { %1088 = vsyncpa [#allocation18], 1 }
 0x8b5   :  { %1089 = vsyncpa [#allocation21], 1 }
 0x8b6   :  { %1090 = vsyncpa [#allocation4], 1 }

</bundles_post_ra>
